<compile_context>
chip_gen: v5e
topology: v5e:2x2
jax: 0.10.0
libtpu: 0.0.40
codegen_flags: <defaults>
</compile_context>

<pallas_src>
import functools

import numpy as np
import jax
import jax.numpy as jnp
from jax import lax
from jax.experimental import pallas as pl
from jax.experimental.pallas import tpu as pltpu


def _unet_encode_kernel(x_ref, w1_ref, b1_ref, w2_ref, b2_ref, mask_ref, sel_ref,
                        out_ref, *, H, W):
    """All arrays are (rows=batch*channels on sublanes, lanes=H*W flat spatial)."""
    HW = H * W

    def conv3x3(src, w_ref):
        # src: (rows_in, HW).  Returns (rows_out, HW) = sum over 9 taps of
        #   w_tap (rows_out, rows_in) @ (tap_mask * shifted(src)).
        # pltpu.roll matches jnp.roll: result[q] = src[(q - amount) % HW], so an
        # amount of (-s) % HW reads src at q + s (zero-pad handled by the mask).
        acc = None
        for dy in range(3):
            for dx in range(3):
                t = dy * 3 + dx
                s = (dy - 1) * W + (dx - 1)
                tap = src if s == 0 else pltpu.roll(src, (-s) % HW, 1)
                if not (dy == 1 and dx == 1):
                    tap = tap * mask_ref[t]            # (1, HW) {0,1} border mask
                part = jnp.dot(w_ref[t], tap, preferred_element_type=jnp.float32)
                acc = part if acc is None else acc + part
        return acc

    x = x_ref[...]                                      # (B*Cin, HW)
    h1 = jnp.maximum(conv3x3(x, w1_ref) + b1_ref[...], 0.0)
    # Dropout2d(p): identity in eval/inference mode (deterministic forward).
    h2 = jnp.maximum(conv3x3(h1, w2_ref) + b2_ref[...], 0.0)

    # 2x2 / stride-2 max pool, lane-dense: pair-max along W, then along H.
    m = jnp.maximum(h2, pltpu.roll(h2, HW - 1, 1))      # m[q] = max(h2[q], h2[q+1])
    m = jnp.maximum(m, pltpu.roll(m, HW - W, 1))        # full 2x2 window max at q
    # One-hot compaction matmul picks the (even y, even x) anchors -> (B*Cout, Hp*Wp).
    out_ref[...] = jnp.dot(m, sel_ref[...], preferred_element_type=jnp.float32)


def unet_encode(x_nchw, w1, b1, w2, b2):
    """UNetEncode forward. x: (N, Cin, H, W) NCHW -> (N, Cout, H//2, W//2) NCHW.

    w1: (3, 3, Cin, Cout) HWIO, b1: (Cout,), w2: (3, 3, Cout, Cout) HWIO, b2: (Cout,).
    """
    N, Cin, H, W = x_nchw.shape
    Cout = w1.shape[-1]
    assert w1.shape == (3, 3, Cin, Cout) and w2.shape == (3, 3, Cout, Cout)
    assert H % 2 == 0 and W % 2 == 0          # see TODO(synk) on ceil_mode
    Hp, Wp = H // 2, W // 2
    HW, HpWp = H * W, Hp * Wp

    # Images per grid step: largest divisor of N (capped) that keeps the batch-folded
    # channel rows sublane (8) aligned; falling back to the full batch keeps the
    # block shapes legal in every case.
    B = N
    for b in range(min(N, 8), 0, -1):
        if N % b == 0 and (b * Cin) % 8 == 0 and (b * Cout) % 8 == 0:
            B = b
            break
    steps = N // B

    f32 = jnp.float32
    x2d = x_nchw.astype(f32).reshape(N * Cin, HW)       # NCHW-flat rows; reshape only

    # Per-tap block-diagonal weights: rows/cols are (image, channel) folded on sublanes.
    eye_b = jnp.eye(B, dtype=f32)
    w1_bd = jnp.stack([jnp.kron(eye_b, w1[dy, dx].astype(f32).T)
                       for dy in range(3) for dx in range(3)])   # (9, B*Cout, B*Cin)
    w2_bd = jnp.stack([jnp.kron(eye_b, w2[dy, dx].astype(f32).T)
                       for dy in range(3) for dx in range(3)])   # (9, B*Cout, B*Cout)
    b1_bd = jnp.tile(b1.astype(f32), B).reshape(B * Cout, 1)
    b2_bd = jnp.tile(b2.astype(f32), B).reshape(B * Cout, 1)

    # {0,1} border masks realizing SAME/zero padding for each of the 9 taps
    # (computed host-side once; resident in VMEM across all grid steps).
    q = np.arange(HW)
    yy, xx = q // W, q % W
    masks = np.ones((9, 1, HW), np.float32)
    for dy in range(3):
        for dx in range(3):
            ok = ((yy + dy - 1 >= 0) & (yy + dy - 1 <= H - 1) &
                  (xx + dx - 1 >= 0) & (xx + dx - 1 <= W - 1))
            masks[dy * 3 + dx, 0, :] = ok.astype(np.float32)

    # One-hot pooling-compaction matrix: output r=(yp,xp) <- flat anchor 2*yp*W + 2*xp.
    r = np.arange(HpWp)
    sel = np.zeros((HW, HpWp), np.float32)
    sel[2 * (r // Wp) * W + 2 * (r % Wp), r] = 1.0

    kernel = functools.partial(_unet_encode_kernel, H=H, W=W)

    flops_per_img = 2 * 9 * HW * Cout * (Cin + Cout) + 2 * HW * HpWp * Cout
    cost = pl.CostEstimate(
        flops=N * flops_per_img,
        transcendentals=0,
        bytes_accessed=4 * (N * Cin * HW + N * Cout * HpWp + HW * HpWp + 9 * HW
                            + 9 * B * Cout * B * (Cin + Cout) + 2 * B * Cout))

    out2d = pl.pallas_call(
        kernel,
        out_shape=jax.ShapeDtypeStruct((N * Cout, HpWp), f32),
        grid_spec=pltpu.PrefetchScalarGridSpec(
            num_scalar_prefetch=0,
            grid=(steps,),
            in_specs=[
                pl.BlockSpec((B * Cin, HW), lambda i: (i, 0)),            # x rows
                pl.BlockSpec((9, B * Cout, B * Cin), lambda i: (0, 0, 0)),  # w1 taps
                pl.BlockSpec((B * Cout, 1), lambda i: (0, 0)),            # b1
                pl.BlockSpec((9, B * Cout, B * Cout), lambda i: (0, 0, 0)),  # w2 taps
                pl.BlockSpec((B * Cout, 1), lambda i: (0, 0)),            # b2
                pl.BlockSpec((9, 1, HW), lambda i: (0, 0, 0)),            # tap masks
                pl.BlockSpec((HW, HpWp), lambda i: (0, 0)),               # pool selector
            ],
            out_specs=pl.BlockSpec((B * Cout, HpWp), lambda i: (i, 0)),
        ),
        # No scratch / cross-step state -> batch axis may run on both v7x TensorCores.
        compiler_params=pltpu.CompilerParams(dimension_semantics=("parallel",)),
        cost_estimate=cost,
    )(x2d, w1_bd, b1_bd, w2_bd, b2_bd, jnp.asarray(masks), jnp.asarray(sel))

    return out2d.reshape(N, Cout, Hp, Wp)                                  # NCHW


def _reference(x_nchw, w1, b1, w2, b2):
    """Pure-JAX reference matching the PyTorch module in eval mode."""
    dn = ('NHWC', 'HWIO', 'NHWC')
    x = jnp.transpose(x_nchw, (0, 2, 3, 1))
    y = lax.conv_general_dilated(x, w1, (1, 1), 'SAME', dimension_numbers=dn,
                                 precision=lax.Precision.HIGHEST) + b1
    y = jnp.maximum(y, 0.0)
    y = lax.conv_general_dilated(y, w2, (1, 1), 'SAME', dimension_numbers=dn,
                                 precision=lax.Precision.HIGHEST) + b2
    y = jnp.maximum(y, 0.0)  # Dropout2d = identity in eval mode
    y = lax.reduce_window(y, -jnp.inf, lax.max, (1, 2, 2, 1), (1, 2, 2, 1), 'VALID')
    return jnp.transpose(y, (0, 3, 1, 2))


if __name__ == "__main__":
    N, Cin, Cout, H, W = 2, 4, 8, 16, 16

    key = jax.random.PRNGKey(0)
    kx, kw1, kb1, kw2, kb2 = jax.random.split(key, 5)
    x = jax.random.normal(kx, (N, Cin, H, W), jnp.float32)
    # Synthetic Conv2d parameters stored in HWIO (same layout fed to the reference).
    w1 = jax.random.normal(kw1, (3, 3, Cin, Cout), jnp.float32) * 0.2
    b1 = jax.random.normal(kb1, (Cout,), jnp.float32) * 0.1
    w2 = jax.random.normal(kw2, (3, 3, Cout, Cout), jnp.float32) * 0.15
    b2 = jax.random.normal(kb2, (Cout,), jnp.float32) * 0.1

    out = jax.block_until_ready(unet_encode(x, w1, b1, w2, b2))
    ref = jax.block_until_ready(_reference(x, w1, b1, w2, b2))

    assert out.shape == (N, Cout, H // 2, W // 2), out.shape
    np.testing.assert_allclose(np.asarray(out), np.asarray(ref), atol=2e-4, rtol=2e-4)
    print("KERNEL_OK")
</pallas_src>

<mosaic_0001>
module attributes {stable_mosaic.version = 11 : i64} {
  func.func @_unet_encode_kernel(%arg0: i32, %arg1: memref<8x256xf32, #tpu.memory_space<vmem>>, %arg2: memref<9x16x8xf32, #tpu.memory_space<vmem>>, %arg3: memref<16x1xf32, #tpu.memory_space<vmem>>, %arg4: memref<9x16x16xf32, #tpu.memory_space<vmem>>, %arg5: memref<16x1xf32, #tpu.memory_space<vmem>>, %arg6: memref<9x1x256xf32, #tpu.memory_space<vmem>>, %arg7: memref<256x64xf32, #tpu.memory_space<vmem>>, %arg8: memref<16x64xf32, #tpu.memory_space<vmem>>) attributes {dimension_semantics = [#tpu.dimension_semantics<parallel>], iteration_bounds = array<i64: 1>, scalar_prefetch = 0 : i64, scratch_operands = 0 : i64, tpu.core_type = #tpu.core_type<tc>, window_params = [{transform_indices = @transform_0, window_bounds = array<i64: 8, 256>}, {pipeline_mode = #tpu.pipeline_mode<synchronous>, transform_indices = @transform_1, window_bounds = array<i64: 9, 16, 8>}, {pipeline_mode = #tpu.pipeline_mode<synchronous>, transform_indices = @transform_2, window_bounds = array<i64: 16, 1>}, {pipeline_mode = #tpu.pipeline_mode<synchronous>, transform_indices = @transform_3, window_bounds = array<i64: 9, 16, 16>}, {pipeline_mode = #tpu.pipeline_mode<synchronous>, transform_indices = @transform_4, window_bounds = array<i64: 16, 1>}, {pipeline_mode = #tpu.pipeline_mode<synchronous>, transform_indices = @transform_5, window_bounds = array<i64: 9, 1, 256>}, {pipeline_mode = #tpu.pipeline_mode<synchronous>, transform_indices = @transform_6, window_bounds = array<i64: 256, 64>}, {transform_indices = @transform_7, window_bounds = array<i64: 16, 64>}]} {
    %c0 = arith.constant 0 : index
    %c0_0 = arith.constant 0 : index
    %0 = vector.load %arg1[%c0, %c0_0] : memref<8x256xf32, #tpu.memory_space<vmem>>, vector<8x256xf32>
    %c17_i32 = arith.constant 17 : i32
    %1 = tpu.dynamic_rotate %0 by %c17_i32 dim 1 : vector<8x256xf32>, i32 -> vector<8x256xf32>
    %c0_1 = arith.constant 0 : index
    %c0_2 = arith.constant 0 : index
    %c0_3 = arith.constant 0 : index
    %2 = vector.load %arg6[%c0_1, %c0_2, %c0_3] : memref<9x1x256xf32, #tpu.memory_space<vmem>>, vector<1x1x256xf32>
    %3 = vector.shape_cast %2 : vector<1x1x256xf32> to vector<1x256xf32>
    %4 = vector.broadcast %3 : vector<1x256xf32> to vector<8x256xf32>
    %5 = arith.mulf %1, %4 : vector<8x256xf32>
    %c0_4 = arith.constant 0 : index
    %c0_5 = arith.constant 0 : index
    %c0_6 = arith.constant 0 : index
    %6 = vector.load %arg2[%c0_4, %c0_5, %c0_6] : memref<9x16x8xf32, #tpu.memory_space<vmem>>, vector<1x16x8xf32>
    %7 = vector.shape_cast %6 : vector<1x16x8xf32> to vector<16x8xf32>
    %cst = arith.constant dense<0.000000e+00> : vector<16x256xf32>
    %8 = tpu.matmul %7, %5, %cst {dimension_numbers = #tpu.dot_dimension_numbers<[1], [0], [0], [1], [0, 0, 1, 1], [], []>} : vector<16x8xf32>, vector<8x256xf32>, vector<16x256xf32> -> vector<16x256xf32>
    %c16_i32 = arith.constant 16 : i32
    %9 = tpu.dynamic_rotate %0 by %c16_i32 dim 1 : vector<8x256xf32>, i32 -> vector<8x256xf32>
    %c1 = arith.constant 1 : index
    %c0_7 = arith.constant 0 : index
    %c0_8 = arith.constant 0 : index
    %10 = vector.load %arg6[%c1, %c0_7, %c0_8] : memref<9x1x256xf32, #tpu.memory_space<vmem>>, vector<1x1x256xf32>
    %11 = vector.shape_cast %10 : vector<1x1x256xf32> to vector<1x256xf32>
    %12 = vector.broadcast %11 : vector<1x256xf32> to vector<8x256xf32>
    %13 = arith.mulf %9, %12 : vector<8x256xf32>
    %c1_9 = arith.constant 1 : index
    %c0_10 = arith.constant 0 : index
    %c0_11 = arith.constant 0 : index
    %14 = vector.load %arg2[%c1_9, %c0_10, %c0_11] : memref<9x16x8xf32, #tpu.memory_space<vmem>>, vector<1x16x8xf32>
    %15 = vector.shape_cast %14 : vector<1x16x8xf32> to vector<16x8xf32>
    %cst_12 = arith.constant dense<0.000000e+00> : vector<16x256xf32>
    %16 = tpu.matmul %15, %13, %cst_12 {dimension_numbers = #tpu.dot_dimension_numbers<[1], [0], [0], [1], [0, 0, 1, 1], [], []>} : vector<16x8xf32>, vector<8x256xf32>, vector<16x256xf32> -> vector<16x256xf32>
    %17 = arith.addf %8, %16 : vector<16x256xf32>
    %c15_i32 = arith.constant 15 : i32
    %18 = tpu.dynamic_rotate %0 by %c15_i32 dim 1 : vector<8x256xf32>, i32 -> vector<8x256xf32>
    %c2 = arith.constant 2 : index
    %c0_13 = arith.constant 0 : index
    %c0_14 = arith.constant 0 : index
    %19 = vector.load %arg6[%c2, %c0_13, %c0_14] : memref<9x1x256xf32, #tpu.memory_space<vmem>>, vector<1x1x256xf32>
    %20 = vector.shape_cast %19 : vector<1x1x256xf32> to vector<1x256xf32>
    %21 = vector.broadcast %20 : vector<1x256xf32> to vector<8x256xf32>
    %22 = arith.mulf %18, %21 : vector<8x256xf32>
    %c2_15 = arith.constant 2 : index
    %c0_16 = arith.constant 0 : index
    %c0_17 = arith.constant 0 : index
    %23 = vector.load %arg2[%c2_15, %c0_16, %c0_17] : memref<9x16x8xf32, #tpu.memory_space<vmem>>, vector<1x16x8xf32>
    %24 = vector.shape_cast %23 : vector<1x16x8xf32> to vector<16x8xf32>
    %cst_18 = arith.constant dense<0.000000e+00> : vector<16x256xf32>
    %25 = tpu.matmul %24, %22, %cst_18 {dimension_numbers = #tpu.dot_dimension_numbers<[1], [0], [0], [1], [0, 0, 1, 1], [], []>} : vector<16x8xf32>, vector<8x256xf32>, vector<16x256xf32> -> vector<16x256xf32>
    %26 = arith.addf %17, %25 : vector<16x256xf32>
    %c1_i32 = arith.constant 1 : i32
    %27 = tpu.dynamic_rotate %0 by %c1_i32 dim 1 : vector<8x256xf32>, i32 -> vector<8x256xf32>
    %c3 = arith.constant 3 : index
    %c0_19 = arith.constant 0 : index
    %c0_20 = arith.constant 0 : index
    %28 = vector.load %arg6[%c3, %c0_19, %c0_20] : memref<9x1x256xf32, #tpu.memory_space<vmem>>, vector<1x1x256xf32>
    %29 = vector.shape_cast %28 : vector<1x1x256xf32> to vector<1x256xf32>
    %30 = vector.broadcast %29 : vector<1x256xf32> to vector<8x256xf32>
    %31 = arith.mulf %27, %30 : vector<8x256xf32>
    %c3_21 = arith.constant 3 : index
    %c0_22 = arith.constant 0 : index
    %c0_23 = arith.constant 0 : index
    %32 = vector.load %arg2[%c3_21, %c0_22, %c0_23] : memref<9x16x8xf32, #tpu.memory_space<vmem>>, vector<1x16x8xf32>
    %33 = vector.shape_cast %32 : vector<1x16x8xf32> to vector<16x8xf32>
    %cst_24 = arith.constant dense<0.000000e+00> : vector<16x256xf32>
    %34 = tpu.matmul %33, %31, %cst_24 {dimension_numbers = #tpu.dot_dimension_numbers<[1], [0], [0], [1], [0, 0, 1, 1], [], []>} : vector<16x8xf32>, vector<8x256xf32>, vector<16x256xf32> -> vector<16x256xf32>
    %35 = arith.addf %26, %34 : vector<16x256xf32>
    %c4 = arith.constant 4 : index
    %c0_25 = arith.constant 0 : index
    %c0_26 = arith.constant 0 : index
    %36 = vector.load %arg2[%c4, %c0_25, %c0_26] : memref<9x16x8xf32, #tpu.memory_space<vmem>>, vector<1x16x8xf32>
    %37 = vector.shape_cast %36 : vector<1x16x8xf32> to vector<16x8xf32>
    %cst_27 = arith.constant dense<0.000000e+00> : vector<16x256xf32>
    %38 = tpu.matmul %37, %0, %cst_27 {dimension_numbers = #tpu.dot_dimension_numbers<[1], [0], [0], [1], [0, 0, 1, 1], [], []>} : vector<16x8xf32>, vector<8x256xf32>, vector<16x256xf32> -> vector<16x256xf32>
    %39 = arith.addf %35, %38 : vector<16x256xf32>
    %c255_i32 = arith.constant 255 : i32
    %40 = tpu.dynamic_rotate %0 by %c255_i32 dim 1 : vector<8x256xf32>, i32 -> vector<8x256xf32>
    %c5 = arith.constant 5 : index
    %c0_28 = arith.constant 0 : index
    %c0_29 = arith.constant 0 : index
    %41 = vector.load %arg6[%c5, %c0_28, %c0_29] : memref<9x1x256xf32, #tpu.memory_space<vmem>>, vector<1x1x256xf32>
    %42 = vector.shape_cast %41 : vector<1x1x256xf32> to vector<1x256xf32>
    %43 = vector.broadcast %42 : vector<1x256xf32> to vector<8x256xf32>
    %44 = arith.mulf %40, %43 : vector<8x256xf32>
    %c5_30 = arith.constant 5 : index
    %c0_31 = arith.constant 0 : index
    %c0_32 = arith.constant 0 : index
    %45 = vector.load %arg2[%c5_30, %c0_31, %c0_32] : memref<9x16x8xf32, #tpu.memory_space<vmem>>, vector<1x16x8xf32>
    %46 = vector.shape_cast %45 : vector<1x16x8xf32> to vector<16x8xf32>
    %cst_33 = arith.constant dense<0.000000e+00> : vector<16x256xf32>
    %47 = tpu.matmul %46, %44, %cst_33 {dimension_numbers = #tpu.dot_dimension_numbers<[1], [0], [0], [1], [0, 0, 1, 1], [], []>} : vector<16x8xf32>, vector<8x256xf32>, vector<16x256xf32> -> vector<16x256xf32>
    %48 = arith.addf %39, %47 : vector<16x256xf32>
    %c241_i32 = arith.constant 241 : i32
    %49 = tpu.dynamic_rotate %0 by %c241_i32 dim 1 : vector<8x256xf32>, i32 -> vector<8x256xf32>
    %c6 = arith.constant 6 : index
    %c0_34 = arith.constant 0 : index
    %c0_35 = arith.constant 0 : index
    %50 = vector.load %arg6[%c6, %c0_34, %c0_35] : memref<9x1x256xf32, #tpu.memory_space<vmem>>, vector<1x1x256xf32>
    %51 = vector.shape_cast %50 : vector<1x1x256xf32> to vector<1x256xf32>
    %52 = vector.broadcast %51 : vector<1x256xf32> to vector<8x256xf32>
    %53 = arith.mulf %49, %52 : vector<8x256xf32>
    %c6_36 = arith.constant 6 : index
    %c0_37 = arith.constant 0 : index
    %c0_38 = arith.constant 0 : index
    %54 = vector.load %arg2[%c6_36, %c0_37, %c0_38] : memref<9x16x8xf32, #tpu.memory_space<vmem>>, vector<1x16x8xf32>
    %55 = vector.shape_cast %54 : vector<1x16x8xf32> to vector<16x8xf32>
    %cst_39 = arith.constant dense<0.000000e+00> : vector<16x256xf32>
    %56 = tpu.matmul %55, %53, %cst_39 {dimension_numbers = #tpu.dot_dimension_numbers<[1], [0], [0], [1], [0, 0, 1, 1], [], []>} : vector<16x8xf32>, vector<8x256xf32>, vector<16x256xf32> -> vector<16x256xf32>
    %57 = arith.addf %48, %56 : vector<16x256xf32>
    %c240_i32 = arith.constant 240 : i32
    %58 = tpu.dynamic_rotate %0 by %c240_i32 dim 1 : vector<8x256xf32>, i32 -> vector<8x256xf32>
    %c7 = arith.constant 7 : index
    %c0_40 = arith.constant 0 : index
    %c0_41 = arith.constant 0 : index
    %59 = vector.load %arg6[%c7, %c0_40, %c0_41] : memref<9x1x256xf32, #tpu.memory_space<vmem>>, vector<1x1x256xf32>
    %60 = vector.shape_cast %59 : vector<1x1x256xf32> to vector<1x256xf32>
    %61 = vector.broadcast %60 : vector<1x256xf32> to vector<8x256xf32>
    %62 = arith.mulf %58, %61 : vector<8x256xf32>
    %c7_42 = arith.constant 7 : index
    %c0_43 = arith.constant 0 : index
    %c0_44 = arith.constant 0 : index
    %63 = vector.load %arg2[%c7_42, %c0_43, %c0_44] : memref<9x16x8xf32, #tpu.memory_space<vmem>>, vector<1x16x8xf32>
    %64 = vector.shape_cast %63 : vector<1x16x8xf32> to vector<16x8xf32>
    %cst_45 = arith.constant dense<0.000000e+00> : vector<16x256xf32>
    %65 = tpu.matmul %64, %62, %cst_45 {dimension_numbers = #tpu.dot_dimension_numbers<[1], [0], [0], [1], [0, 0, 1, 1], [], []>} : vector<16x8xf32>, vector<8x256xf32>, vector<16x256xf32> -> vector<16x256xf32>
    %66 = arith.addf %57, %65 : vector<16x256xf32>
    %c239_i32 = arith.constant 239 : i32
    %67 = tpu.dynamic_rotate %0 by %c239_i32 dim 1 : vector<8x256xf32>, i32 -> vector<8x256xf32>
    %c8 = arith.constant 8 : index
    %c0_46 = arith.constant 0 : index
    %c0_47 = arith.constant 0 : index
    %68 = vector.load %arg6[%c8, %c0_46, %c0_47] : memref<9x1x256xf32, #tpu.memory_space<vmem>>, vector<1x1x256xf32>
    %69 = vector.shape_cast %68 : vector<1x1x256xf32> to vector<1x256xf32>
    %70 = vector.broadcast %69 : vector<1x256xf32> to vector<8x256xf32>
    %71 = arith.mulf %67, %70 : vector<8x256xf32>
    %c8_48 = arith.constant 8 : index
    %c0_49 = arith.constant 0 : index
    %c0_50 = arith.constant 0 : index
    %72 = vector.load %arg2[%c8_48, %c0_49, %c0_50] : memref<9x16x8xf32, #tpu.memory_space<vmem>>, vector<1x16x8xf32>
    %73 = vector.shape_cast %72 : vector<1x16x8xf32> to vector<16x8xf32>
    %cst_51 = arith.constant dense<0.000000e+00> : vector<16x256xf32>
    %74 = tpu.matmul %73, %71, %cst_51 {dimension_numbers = #tpu.dot_dimension_numbers<[1], [0], [0], [1], [0, 0, 1, 1], [], []>} : vector<16x8xf32>, vector<8x256xf32>, vector<16x256xf32> -> vector<16x256xf32>
    %75 = arith.addf %66, %74 : vector<16x256xf32>
    %c0_52 = arith.constant 0 : index
    %c0_53 = arith.constant 0 : index
    %76 = vector.load %arg3[%c0_52, %c0_53] : memref<16x1xf32, #tpu.memory_space<vmem>>, vector<16x1xf32>
    %77 = vector.broadcast %76 : vector<16x1xf32> to vector<16x256xf32>
    %78 = arith.addf %75, %77 : vector<16x256xf32>
    %cst_54 = arith.constant 0.000000e+00 : f32
    %79 = vector.broadcast %cst_54 : f32 to vector<16x256xf32>
    %80 = arith.maximumf %78, %79 : vector<16x256xf32>
    %c17_i32_55 = arith.constant 17 : i32
    %81 = tpu.dynamic_rotate %80 by %c17_i32_55 dim 1 : vector<16x256xf32>, i32 -> vector<16x256xf32>
    %c0_56 = arith.constant 0 : index
    %c0_57 = arith.constant 0 : index
    %c0_58 = arith.constant 0 : index
    %82 = vector.load %arg6[%c0_56, %c0_57, %c0_58] : memref<9x1x256xf32, #tpu.memory_space<vmem>>, vector<1x1x256xf32>
    %83 = vector.shape_cast %82 : vector<1x1x256xf32> to vector<1x256xf32>
    %84 = vector.broadcast %83 : vector<1x256xf32> to vector<16x256xf32>
    %85 = arith.mulf %81, %84 : vector<16x256xf32>
    %c0_59 = arith.constant 0 : index
    %c0_60 = arith.constant 0 : index
    %c0_61 = arith.constant 0 : index
    %86 = vector.load %arg4[%c0_59, %c0_60, %c0_61] : memref<9x16x16xf32, #tpu.memory_space<vmem>>, vector<1x16x16xf32>
    %87 = vector.shape_cast %86 : vector<1x16x16xf32> to vector<16x16xf32>
    %cst_62 = arith.constant dense<0.000000e+00> : vector<16x256xf32>
    %88 = tpu.matmul %87, %85, %cst_62 {dimension_numbers = #tpu.dot_dimension_numbers<[1], [0], [0], [1], [0, 0, 1, 1], [], []>} : vector<16x16xf32>, vector<16x256xf32>, vector<16x256xf32> -> vector<16x256xf32>
    %c16_i32_63 = arith.constant 16 : i32
    %89 = tpu.dynamic_rotate %80 by %c16_i32_63 dim 1 : vector<16x256xf32>, i32 -> vector<16x256xf32>
    %c1_64 = arith.constant 1 : index
    %c0_65 = arith.constant 0 : index
    %c0_66 = arith.constant 0 : index
    %90 = vector.load %arg6[%c1_64, %c0_65, %c0_66] : memref<9x1x256xf32, #tpu.memory_space<vmem>>, vector<1x1x256xf32>
    %91 = vector.shape_cast %90 : vector<1x1x256xf32> to vector<1x256xf32>
    %92 = vector.broadcast %91 : vector<1x256xf32> to vector<16x256xf32>
    %93 = arith.mulf %89, %92 : vector<16x256xf32>
    %c1_67 = arith.constant 1 : index
    %c0_68 = arith.constant 0 : index
    %c0_69 = arith.constant 0 : index
    %94 = vector.load %arg4[%c1_67, %c0_68, %c0_69] : memref<9x16x16xf32, #tpu.memory_space<vmem>>, vector<1x16x16xf32>
    %95 = vector.shape_cast %94 : vector<1x16x16xf32> to vector<16x16xf32>
    %cst_70 = arith.constant dense<0.000000e+00> : vector<16x256xf32>
    %96 = tpu.matmul %95, %93, %cst_70 {dimension_numbers = #tpu.dot_dimension_numbers<[1], [0], [0], [1], [0, 0, 1, 1], [], []>} : vector<16x16xf32>, vector<16x256xf32>, vector<16x256xf32> -> vector<16x256xf32>
    %97 = arith.addf %88, %96 : vector<16x256xf32>
    %c15_i32_71 = arith.constant 15 : i32
    %98 = tpu.dynamic_rotate %80 by %c15_i32_71 dim 1 : vector<16x256xf32>, i32 -> vector<16x256xf32>
    %c2_72 = arith.constant 2 : index
    %c0_73 = arith.constant 0 : index
    %c0_74 = arith.constant 0 : index
    %99 = vector.load %arg6[%c2_72, %c0_73, %c0_74] : memref<9x1x256xf32, #tpu.memory_space<vmem>>, vector<1x1x256xf32>
    %100 = vector.shape_cast %99 : vector<1x1x256xf32> to vector<1x256xf32>
    %101 = vector.broadcast %100 : vector<1x256xf32> to vector<16x256xf32>
    %102 = arith.mulf %98, %101 : vector<16x256xf32>
    %c2_75 = arith.constant 2 : index
    %c0_76 = arith.constant 0 : index
    %c0_77 = arith.constant 0 : index
    %103 = vector.load %arg4[%c2_75, %c0_76, %c0_77] : memref<9x16x16xf32, #tpu.memory_space<vmem>>, vector<1x16x16xf32>
    %104 = vector.shape_cast %103 : vector<1x16x16xf32> to vector<16x16xf32>
    %cst_78 = arith.constant dense<0.000000e+00> : vector<16x256xf32>
    %105 = tpu.matmul %104, %102, %cst_78 {dimension_numbers = #tpu.dot_dimension_numbers<[1], [0], [0], [1], [0, 0, 1, 1], [], []>} : vector<16x16xf32>, vector<16x256xf32>, vector<16x256xf32> -> vector<16x256xf32>
    %106 = arith.addf %97, %105 : vector<16x256xf32>
    %c1_i32_79 = arith.constant 1 : i32
    %107 = tpu.dynamic_rotate %80 by %c1_i32_79 dim 1 : vector<16x256xf32>, i32 -> vector<16x256xf32>
    %c3_80 = arith.constant 3 : index
    %c0_81 = arith.constant 0 : index
    %c0_82 = arith.constant 0 : index
    %108 = vector.load %arg6[%c3_80, %c0_81, %c0_82] : memref<9x1x256xf32, #tpu.memory_space<vmem>>, vector<1x1x256xf32>
    %109 = vector.shape_cast %108 : vector<1x1x256xf32> to vector<1x256xf32>
    %110 = vector.broadcast %109 : vector<1x256xf32> to vector<16x256xf32>
    %111 = arith.mulf %107, %110 : vector<16x256xf32>
    %c3_83 = arith.constant 3 : index
    %c0_84 = arith.constant 0 : index
    %c0_85 = arith.constant 0 : index
    %112 = vector.load %arg4[%c3_83, %c0_84, %c0_85] : memref<9x16x16xf32, #tpu.memory_space<vmem>>, vector<1x16x16xf32>
    %113 = vector.shape_cast %112 : vector<1x16x16xf32> to vector<16x16xf32>
    %cst_86 = arith.constant dense<0.000000e+00> : vector<16x256xf32>
    %114 = tpu.matmul %113, %111, %cst_86 {dimension_numbers = #tpu.dot_dimension_numbers<[1], [0], [0], [1], [0, 0, 1, 1], [], []>} : vector<16x16xf32>, vector<16x256xf32>, vector<16x256xf32> -> vector<16x256xf32>
    %115 = arith.addf %106, %114 : vector<16x256xf32>
    %c4_87 = arith.constant 4 : index
    %c0_88 = arith.constant 0 : index
    %c0_89 = arith.constant 0 : index
    %116 = vector.load %arg4[%c4_87, %c0_88, %c0_89] : memref<9x16x16xf32, #tpu.memory_space<vmem>>, vector<1x16x16xf32>
    %117 = vector.shape_cast %116 : vector<1x16x16xf32> to vector<16x16xf32>
    %cst_90 = arith.constant dense<0.000000e+00> : vector<16x256xf32>
    %118 = tpu.matmul %117, %80, %cst_90 {dimension_numbers = #tpu.dot_dimension_numbers<[1], [0], [0], [1], [0, 0, 1, 1], [], []>} : vector<16x16xf32>, vector<16x256xf32>, vector<16x256xf32> -> vector<16x256xf32>
    %119 = arith.addf %115, %118 : vector<16x256xf32>
    %c255_i32_91 = arith.constant 255 : i32
    %120 = tpu.dynamic_rotate %80 by %c255_i32_91 dim 1 : vector<16x256xf32>, i32 -> vector<16x256xf32>
    %c5_92 = arith.constant 5 : index
    %c0_93 = arith.constant 0 : index
    %c0_94 = arith.constant 0 : index
    %121 = vector.load %arg6[%c5_92, %c0_93, %c0_94] : memref<9x1x256xf32, #tpu.memory_space<vmem>>, vector<1x1x256xf32>
    %122 = vector.shape_cast %121 : vector<1x1x256xf32> to vector<1x256xf32>
    %123 = vector.broadcast %122 : vector<1x256xf32> to vector<16x256xf32>
    %124 = arith.mulf %120, %123 : vector<16x256xf32>
    %c5_95 = arith.constant 5 : index
    %c0_96 = arith.constant 0 : index
    %c0_97 = arith.constant 0 : index
    %125 = vector.load %arg4[%c5_95, %c0_96, %c0_97] : memref<9x16x16xf32, #tpu.memory_space<vmem>>, vector<1x16x16xf32>
    %126 = vector.shape_cast %125 : vector<1x16x16xf32> to vector<16x16xf32>
    %cst_98 = arith.constant dense<0.000000e+00> : vector<16x256xf32>
    %127 = tpu.matmul %126, %124, %cst_98 {dimension_numbers = #tpu.dot_dimension_numbers<[1], [0], [0], [1], [0, 0, 1, 1], [], []>} : vector<16x16xf32>, vector<16x256xf32>, vector<16x256xf32> -> vector<16x256xf32>
    %128 = arith.addf %119, %127 : vector<16x256xf32>
    %c241_i32_99 = arith.constant 241 : i32
    %129 = tpu.dynamic_rotate %80 by %c241_i32_99 dim 1 : vector<16x256xf32>, i32 -> vector<16x256xf32>
    %c6_100 = arith.constant 6 : index
    %c0_101 = arith.constant 0 : index
    %c0_102 = arith.constant 0 : index
    %130 = vector.load %arg6[%c6_100, %c0_101, %c0_102] : memref<9x1x256xf32, #tpu.memory_space<vmem>>, vector<1x1x256xf32>
    %131 = vector.shape_cast %130 : vector<1x1x256xf32> to vector<1x256xf32>
    %132 = vector.broadcast %131 : vector<1x256xf32> to vector<16x256xf32>
    %133 = arith.mulf %129, %132 : vector<16x256xf32>
    %c6_103 = arith.constant 6 : index
    %c0_104 = arith.constant 0 : index
    %c0_105 = arith.constant 0 : index
    %134 = vector.load %arg4[%c6_103, %c0_104, %c0_105] : memref<9x16x16xf32, #tpu.memory_space<vmem>>, vector<1x16x16xf32>
    %135 = vector.shape_cast %134 : vector<1x16x16xf32> to vector<16x16xf32>
    %cst_106 = arith.constant dense<0.000000e+00> : vector<16x256xf32>
    %136 = tpu.matmul %135, %133, %cst_106 {dimension_numbers = #tpu.dot_dimension_numbers<[1], [0], [0], [1], [0, 0, 1, 1], [], []>} : vector<16x16xf32>, vector<16x256xf32>, vector<16x256xf32> -> vector<16x256xf32>
    %137 = arith.addf %128, %136 : vector<16x256xf32>
    %c240_i32_107 = arith.constant 240 : i32
    %138 = tpu.dynamic_rotate %80 by %c240_i32_107 dim 1 : vector<16x256xf32>, i32 -> vector<16x256xf32>
    %c7_108 = arith.constant 7 : index
    %c0_109 = arith.constant 0 : index
    %c0_110 = arith.constant 0 : index
    %139 = vector.load %arg6[%c7_108, %c0_109, %c0_110] : memref<9x1x256xf32, #tpu.memory_space<vmem>>, vector<1x1x256xf32>
    %140 = vector.shape_cast %139 : vector<1x1x256xf32> to vector<1x256xf32>
    %141 = vector.broadcast %140 : vector<1x256xf32> to vector<16x256xf32>
    %142 = arith.mulf %138, %141 : vector<16x256xf32>
    %c7_111 = arith.constant 7 : index
    %c0_112 = arith.constant 0 : index
    %c0_113 = arith.constant 0 : index
    %143 = vector.load %arg4[%c7_111, %c0_112, %c0_113] : memref<9x16x16xf32, #tpu.memory_space<vmem>>, vector<1x16x16xf32>
    %144 = vector.shape_cast %143 : vector<1x16x16xf32> to vector<16x16xf32>
    %cst_114 = arith.constant dense<0.000000e+00> : vector<16x256xf32>
    %145 = tpu.matmul %144, %142, %cst_114 {dimension_numbers = #tpu.dot_dimension_numbers<[1], [0], [0], [1], [0, 0, 1, 1], [], []>} : vector<16x16xf32>, vector<16x256xf32>, vector<16x256xf32> -> vector<16x256xf32>
    %146 = arith.addf %137, %145 : vector<16x256xf32>
    %c239_i32_115 = arith.constant 239 : i32
    %147 = tpu.dynamic_rotate %80 by %c239_i32_115 dim 1 : vector<16x256xf32>, i32 -> vector<16x256xf32>
    %c8_116 = arith.constant 8 : index
    %c0_117 = arith.constant 0 : index
    %c0_118 = arith.constant 0 : index
    %148 = vector.load %arg6[%c8_116, %c0_117, %c0_118] : memref<9x1x256xf32, #tpu.memory_space<vmem>>, vector<1x1x256xf32>
    %149 = vector.shape_cast %148 : vector<1x1x256xf32> to vector<1x256xf32>
    %150 = vector.broadcast %149 : vector<1x256xf32> to vector<16x256xf32>
    %151 = arith.mulf %147, %150 : vector<16x256xf32>
    %c8_119 = arith.constant 8 : index
    %c0_120 = arith.constant 0 : index
    %c0_121 = arith.constant 0 : index
    %152 = vector.load %arg4[%c8_119, %c0_120, %c0_121] : memref<9x16x16xf32, #tpu.memory_space<vmem>>, vector<1x16x16xf32>
    %153 = vector.shape_cast %152 : vector<1x16x16xf32> to vector<16x16xf32>
    %cst_122 = arith.constant dense<0.000000e+00> : vector<16x256xf32>
    %154 = tpu.matmul %153, %151, %cst_122 {dimension_numbers = #tpu.dot_dimension_numbers<[1], [0], [0], [1], [0, 0, 1, 1], [], []>} : vector<16x16xf32>, vector<16x256xf32>, vector<16x256xf32> -> vector<16x256xf32>
    %155 = arith.addf %146, %154 : vector<16x256xf32>
    %c0_123 = arith.constant 0 : index
    %c0_124 = arith.constant 0 : index
    %156 = vector.load %arg5[%c0_123, %c0_124] : memref<16x1xf32, #tpu.memory_space<vmem>>, vector<16x1xf32>
    %157 = vector.broadcast %156 : vector<16x1xf32> to vector<16x256xf32>
    %158 = arith.addf %155, %157 : vector<16x256xf32>
    %cst_125 = arith.constant 0.000000e+00 : f32
    %159 = vector.broadcast %cst_125 : f32 to vector<16x256xf32>
    %160 = arith.maximumf %158, %159 : vector<16x256xf32>
    %c255_i32_126 = arith.constant 255 : i32
    %161 = tpu.dynamic_rotate %160 by %c255_i32_126 dim 1 : vector<16x256xf32>, i32 -> vector<16x256xf32>
    %162 = arith.maximumf %160, %161 : vector<16x256xf32>
    %c240_i32_127 = arith.constant 240 : i32
    %163 = tpu.dynamic_rotate %162 by %c240_i32_127 dim 1 : vector<16x256xf32>, i32 -> vector<16x256xf32>
    %164 = arith.maximumf %162, %163 : vector<16x256xf32>
    %c0_128 = arith.constant 0 : index
    %c0_129 = arith.constant 0 : index
    %165 = vector.load %arg7[%c0_128, %c0_129] : memref<256x64xf32, #tpu.memory_space<vmem>>, vector<256x64xf32>
    %cst_130 = arith.constant dense<0.000000e+00> : vector<16x64xf32>
    %166 = tpu.matmul %164, %165, %cst_130 {dimension_numbers = #tpu.dot_dimension_numbers<[1], [0], [0], [1], [0, 0, 1, 1], [], []>} : vector<16x256xf32>, vector<256x64xf32>, vector<16x64xf32> -> vector<16x64xf32>
    %c0_131 = arith.constant 0 : index
    %c0_132 = arith.constant 0 : index
    %167 = vector.load %arg8[%c0_131, %c0_132] : memref<16x64xf32, #tpu.memory_space<vmem>>, vector<16x64xf32>
    tpu.vector_store %arg8[%c0_131, %c0_132], %166 {strides = array<i32>} : memref<16x64xf32, #tpu.memory_space<vmem>>, vector<16x64xf32>,
    return
  }
  func.func @transform_0(%arg0: i32) -> (i32, i32) {
    %c0_i32 = arith.constant 0 : i32
    %c0_i32_0 = arith.constant 0 : i32
    return %arg0, %c0_i32 : i32, i32
  }
  func.func @transform_1(%arg0: i32) -> (i32, i32, i32) {
    %c0_i32 = arith.constant 0 : i32
    %c0_i32_0 = arith.constant 0 : i32
    %c0_i32_1 = arith.constant 0 : i32
    %c0_i32_2 = arith.constant 0 : i32
    return %c0_i32, %c0_i32_0, %c0_i32_1 : i32, i32, i32
  }
  func.func @transform_2(%arg0: i32) -> (i32, i32) {
    %c0_i32 = arith.constant 0 : i32
    %c0_i32_0 = arith.constant 0 : i32
    %c0_i32_1 = arith.constant 0 : i32
    return %c0_i32, %c0_i32_0 : i32, i32
  }
  func.func @transform_3(%arg0: i32) -> (i32, i32, i32) {
    %c0_i32 = arith.constant 0 : i32
    %c0_i32_0 = arith.constant 0 : i32
    %c0_i32_1 = arith.constant 0 : i32
    %c0_i32_2 = arith.constant 0 : i32
    return %c0_i32, %c0_i32_0, %c0_i32_1 : i32, i32, i32
  }
  func.func @transform_4(%arg0: i32) -> (i32, i32) {
    %c0_i32 = arith.constant 0 : i32
    %c0_i32_0 = arith.constant 0 : i32
    %c0_i32_1 = arith.constant 0 : i32
    return %c0_i32, %c0_i32_0 : i32, i32
  }
  func.func @transform_5(%arg0: i32) -> (i32, i32, i32) {
    %c0_i32 = arith.constant 0 : i32
    %c0_i32_0 = arith.constant 0 : i32
    %c0_i32_1 = arith.constant 0 : i32
    %c0_i32_2 = arith.constant 0 : i32
    return %c0_i32, %c0_i32_0, %c0_i32_1 : i32, i32, i32
  }
  func.func @transform_6(%arg0: i32) -> (i32, i32) {
    %c0_i32 = arith.constant 0 : i32
    %c0_i32_0 = arith.constant 0 : i32
    %c0_i32_1 = arith.constant 0 : i32
    return %c0_i32, %c0_i32_0 : i32, i32
  }
  func.func @transform_7(%arg0: i32) -> (i32, i32) {
    %c0_i32 = arith.constant 0 : i32
    %c0_i32_0 = arith.constant 0 : i32
    return %arg0, %c0_i32 : i32, i32
  }
}

</mosaic_0001>

<bundles_post_ra>
// kernel: tpu_custom_call.1
= control target key start
LH: loop header
LB: loop body
LE: loop exit
PB: predicated region body
PF: predicated region fallthrough
CT: control target
= control target key end

     0   :  { %s2362_s0 = inlined_call_operand.vmem [shape: f32[8,256], index: 0, kind: input, shape index: {}]   ;;  %s2363_s1 = inlined_call_operand.vmem [shape: f32[9,16,8], index: 1, kind: input, shape index: {}]   ;;  %s2364_s2 = inlined_call_operand.vmem [shape: f32[16,1], index: 2, kind: input, shape index: {}]   ;;  %s2365_s3 = inlined_call_operand.vmem [shape: f32[9,16,16], index: 3, kind: input, shape index: {}]   ;;  %s2366_s4 = inlined_call_operand.vmem [shape: f32[16,1], index: 4, kind: input, shape index: {}]   ;;  %s2367_s5 = inlined_call_operand.vmem [shape: f32[9,1,256], index: 5, kind: input, shape index: {}]   ;;  %s2368_s6 = inlined_call_operand.vmem [shape: f32[256,64], index: 6, kind: input, shape index: {}]   ;;  %s2369_s7 = inlined_call_operand.hbm [shape: f32[16,64], index: 7, kind: output, shape index: {}]  }
   0x1   :  { %v27_v0 = vld [vmem:[%s2362_s0] sm:$0xff] }
   0x2   :  { %12 = vsyncpa [#allocation3], 0  ;;  %s1675_s26 = smov 16   ;;  %s1676_s27 = smov 17   ;;  %v28_v1 = vld [vmem:[%s2362_s0 + $0x8] sm:$0xff]  ;;  %v33_v3 = vlaneseq  ;;  %vm67_vm1 = vcmask 64512  }
   0x3   :  { %48 = vrot.lane.b32.xlu0 %v27_v0, %s1675_s26  ;;  %29 = vrot.lane.b32.xlu1 %v27_v0, %s1676_s27  ;;  %s1677_s28 = smov 15   ;;  %s1678_s8 = smov 1   ;;  %v1514_v6 = vld [vmem:[%s2367_s5 + $0x4] sm:$0x3]  ;;  %v1503_v15 = vld [vmem:[%s2367_s5 + $0x2] sm:$0x3] }
   0x4   :  { %172 = vrot.lane.b32.xlu2 %v27_v0, %s1677_s28  ;;  %s1679_s9 = smov 127   ;;  %s1680_s10 = smov 113   ;;  %v1749_v4 = vand.u32 127, %v33_v3  ;;  %v1757_v8 = vperm.slane %v1514_v6, 0  ;;  %v1761_v10 = vperm.slane %v1514_v6, 1  ;;  %v1515_v17 = vld [vmem:[%s2363_s1 + $0x20] sm:$0xff] }
   0x5   :  { %s1681_s0 = smov 112   ;;  %s1682_s11 = smov 111   ;;  %v38_v16 = vld [vmem:[%s2367_s5] sm:$0x3]  ;;  %v1778_v18 = vperm.slane %v1503_v15, 0  ;;  %v1780_v19 = vperm.slane %v1503_v15, 1 }
   0x6   :  { %vm176_vm0 = vcmp.lt.s32.totalorder %v1749_v4, 15  ;;  %vm35_vm2 = vcmp.lt.s32.totalorder %v1749_v4, 17  ;;  %vm52_vm3 = vcmp.lt.s32.totalorder %v1749_v4, 16  ;;  %v1782_v20 = vperm.slane %v38_v16, 0  ;;  %v1504_v30 = vld [vmem:[%s2363_s1 + $0x10] sm:$0xff]  ;;  %v1516_v34 = vld [vmem:[%s2363_s1 + $0x28] sm:$0xff] }
   0x7   :  { %v1784_v21 = vperm.slane %v38_v16, 1  ;;  %v1521_v33 = vld [vmem:[%s2367_s5 + $0x6] sm:$0x3]  ;;  %vm251_vm4 = vcmp.lt.s32.totalorder %v1749_v4, 1  ;;  %v1505_v42 = vld [vmem:[%s2363_s1 + $0x18] sm:$0xff]  ;;  %vm385_vm5 = vcmp.lt.s32.totalorder %v1749_v4, 127 }
   0x8   :  { %v1810_v36 = vperm.slane %v1521_v33, 0  ;;  %v1812_v37 = vperm.slane %v1521_v33, 1  ;;  %v1534_v45 = vld [vmem:[%s2367_s5 + $0xa] sm:$0x3]  ;;  %v1528_v46 = vld [vmem:[%s2363_s1 + $0x40] sm:$0xff]  ;;  %vm460_vm6 = vcmp.lt.s32.totalorder %v1749_v4, 113 }
   0x9   :  { %v1834_v47 = vperm.slane %v1534_v45, 0  ;;  %v1541_v48 = vld [vmem:[%s2367_s5 + $0xc] sm:$0x3]  ;;  %v1839_v49 = vperm.slane %v1534_v45, 1  ;;  %v46_v59 = vld [vmem:[%s2363_s1] sm:$0xff]  ;;  %vm535_vm7 = vcmp.lt.s32.totalorder %v1749_v4, 112 }
   0xa   :  { %v1842_v51 = vperm.slane %v1541_v48, 0  ;;  %v1844_v52 = vperm.slane %v1541_v48, 1  ;;  %v1548_v3 = vld [vmem:[%s2367_s5 + $0xe] sm:$0x3]  ;;  %v1542_v6 = vld [vmem:[%s2363_s1 + $0x60] sm:$0xff]  ;;  %vm610_vm8 = vcmp.lt.s32.totalorder %v1749_v4, 111 }
   0xb   :  { %50 = vrot.lane.b32.xlu0 %v28_v1, %s1675_s26  ;;  %31 = vrot.lane.b32.xlu1 %v28_v1, %s1676_s27  ;;  %v681_v33 = vld [vmem:[%s2364_s2] sm:$0xff]  ;;  %vm738_vm9 = vcmask 130048   ;;  %vm1482_vm10 = vcmask 523264   ;;  %s1686_s14 = smov 8  }
   0xc   :  { %174 = vrot.lane.b32.xlu2 %v28_v1, %s1677_s28 }
  0x13   :  { %249 = vrot.lane.b32.xlu1 %v28_v1, %s1678_s8  ;;  %247 = vrot.lane.b32.xlu0 %v27_v0, %s1678_s8 }
  0x14   :  { %381 = vrot.lane.b32.xlu2 %v27_v0, %s1679_s9 }
  0x1b   :  { %383 = vrot.lane.b32.xlu0 %v28_v1, %s1679_s9  ;;  %456 = vrot.lane.b32.xlu1 %v27_v0, %s1680_s10 }
  0x1c   :  { %458 = vrot.lane.b32.xlu2 %v28_v1, %s1680_s10 }
  0x23   :  { %533 = vrot.lane.b32.xlu1 %v28_v1, %s1681_s0  ;;  %531 = vrot.lane.b32.xlu0 %v27_v0, %s1681_s0 }
  0x24   :  { %606 = vrot.lane.b32.xlu2 %v27_v0, %s1682_s11 }
  0x2b   :  { %608 = vrot.lane.b32.xlu0 %v28_v1, %s1682_s11 }
  0x5e   :  { %v173_v2 = vpop.permute.xlu2 %172 }
  0x66   :  { %v175_v5 = vpop.permute.xlu2 %174 }
  0x67   :  { %v178_v7 = vsel %vm176_vm0, %v175_v5, %v173_v2  ;;  %v177_v9 = vsel %vm176_vm0, %v173_v2, %v175_v5  ;;  %v47_v2 = vld [vmem:[%s2363_s1 + $0x8] sm:$0xff] }
  0x68   :  { %v186_v11 = vmul.f32 %v1757_v8, %v178_v7  ;;  %v187_v12 = vmul.f32 %v1761_v10, %v177_v9  ;;  %v1882_v7 = vperm.slane %v1548_v3, 0  ;;  %v1555_v9 = vld [vmem:[%s2367_s5 + $0x10] sm:$0x3]  ;;  %s1685_s5 = smov 128  }
  0x6a   :  { %212 = vmatpush.msra.mxu0 %v186_v11  ;;  %235 = vmatpush.msra.mxu1 %v187_v12  ;;  %v1887_v11 = vperm.slane %v1548_v3, 1 }
  0x6b   :  { %1517 = vmatmul.msk.f32.vlgmr.msra.gmra.mxu0 %vm67_vm1, %v1515_v17  ;;  %1519 = vmatmul.msk.f32.vlgmr.msra.gmra.mxu1 %vm67_vm1, %v1515_v17 }
  0x6c   :  { %346 = vmatpush.msrb.mxu0 %v27_v0  ;;  %369 = vmatpush.msrb.mxu1 %v28_v1  ;;  %v1529_v0 = vld [vmem:[%s2363_s1 + $0x48] sm:$0xff] }
  0x6e   :  { %v382_v35 = vpop.permute.xlu2 %381 }
  0x73   :  { %1518 = vmatmul.msk.f32.gmra.mxu0 %vm67_vm1, %v1516_v34  ;;  %1520 = vmatmul.msk.f32.gmra.mxu1 %vm67_vm1, %v1516_v34  ;;  %v1683_v34 = vmov 0  }
  0x74   :  { %1626 = vset.pattern.permute.xlu1 %v1683_v34  ;;  %1627 = vset.pattern.permute.xlu2 %v1683_v34 }
  0x75   :  { %v49_v13 = vpop.permute.xlu0 %48  ;;  %v30_v14 = vpop.permute.xlu1 %29  ;;  %685 = vperm.xlu2 %1627, %v681_v33   ;;  %1628 = vset.pattern.permute.xlu0 %v1683_v34 }
  0x76   :  { %v459_v50 = vpop.permute.xlu2 %458 }
  0x7b   :  { %1530 = vmatmul.msk.f32.vlgmr.msrb.gmra.mxu0 %vm67_vm1, %v1528_v46  ;;  %1532 = vmatmul.msk.f32.vlgmr.msrb.gmra.mxu1 %vm67_vm1, %v1528_v46 }
  0x7d   :  { %v51_v22 = vpop.permute.xlu0 %50  ;;  %v32_v23 = vpop.permute.xlu1 %31 }
  0x7e   :  { %v36_v24 = vsel %vm35_vm2, %v30_v14, %v32_v23  ;;  %v37_v25 = vsel %vm35_vm2, %v32_v23, %v30_v14  ;;  %v54_v26 = vsel %vm52_vm3, %v51_v22, %v49_v13  ;;  %v53_v27 = vsel %vm52_vm3, %v49_v13, %v51_v22  ;;  %v607_v12 = vpop.permute.xlu2 %606 }
  0x7f   :  { %v62_v28 = vmul.f32 %v1778_v18, %v54_v26  ;;  %v63_v29 = vmul.f32 %v1780_v19, %v53_v27  ;;  %v44_v31 = vmul.f32 %v1782_v20, %v37_v25  ;;  %v45_v32 = vmul.f32 %v1784_v21, %v36_v24  ;;  %v1522_v24 = vld [vmem:[%s2363_s1 + $0x30] sm:$0xff] }
  0x80   :  { %v1890_v13 = vperm.slane %v1555_v9, 0  ;;  %v1892_v14 = vperm.slane %v1555_v9, 1 }
  0x81   :  { %89 = vmatpush.msra.mxu2 %v62_v28  ;;  %112 = vmatpush.msra.mxu3 %v63_v29  ;;  %v1543_v29 = vld [vmem:[%s2363_s1 + $0x68] sm:$0xff] }
  0x82   :  { %1506 = vmatmul.msk.f32.vlgmr.msra.gmra.mxu2 %vm67_vm1, %v1504_v30  ;;  %1508 = vmatmul.msk.f32.vlgmr.msra.gmra.mxu3 %vm67_vm1, %v1504_v30  ;;  %v1523_v30 = vld [vmem:[%s2363_s1 + $0x38] sm:$0xff] }
  0x83   :  { %141 = vmatpush.msrb.mxu2 %v44_v31  ;;  %164 = vmatpush.msrb.mxu3 %v45_v32  ;;  %v1556_v31 = vld [vmem:[%s2363_s1 + $0x80] sm:$0xff]  ;;  %v682_v32 = vld [vmem:[%s2364_s2 + $0x8] sm:$0xff] }
  0x84   :  { %1531 = vmatmul.msk.f32.gmra.mxu0 %vm67_vm1, %v1529_v0  ;;  %1533 = vmatmul.msk.f32.gmra.mxu1 %vm67_vm1, %v1529_v0 }
  0x85   :  { %v250_v38 = vpop.permute.xlu1 %249  ;;  %v248_v39 = vpop.permute.xlu0 %247  ;;  %690 = vperm.xlu1 %1626, %v682_v32  }
  0x86   :  { %v252_v40 = vsel %vm251_vm4, %v248_v39, %v250_v38  ;;  %v253_v41 = vsel %vm251_vm4, %v250_v38, %v248_v39  ;;  %v1557_v38 = vld [vmem:[%s2363_s1 + $0x88] sm:$0xff]  ;;  %v1536_v39 = vld [vmem:[%s2363_s1 + $0x58] sm:$0xff] }
  0x87   :  { %v261_v43 = vmul.f32 %v1810_v36, %v253_v41  ;;  %v262_v44 = vmul.f32 %v1812_v37, %v252_v40  ;;  %v1549_v40 = vld [vmem:[%s2363_s1 + $0x70] sm:$0xff]  ;;  %v1550_v41 = vld [vmem:[%s2363_s1 + $0x78] sm:$0xff] }
  0x89   :  { %287 = vmatpush.msra.mxu2 %v261_v43  ;;  %310 = vmatpush.msra.mxu3 %v262_v44 }
  0x8a   :  { %1507 = vmatmul.msk.f32.gmra.mxu2 %vm67_vm1, %v1505_v42  ;;  %1509 = vmatmul.msk.f32.gmra.mxu3 %vm67_vm1, %v1505_v42 }
  0x8d   :  { %v384_v53 = vpop.permute.xlu0 %383  ;;  %v457_v54 = vpop.permute.xlu1 %456 }
  0x8e   :  { %v386_v55 = vsel %vm385_vm5, %v382_v35, %v384_v53  ;;  %v387_v56 = vsel %vm385_vm5, %v384_v53, %v382_v35  ;;  %v461_v57 = vsel %vm460_vm6, %v457_v54, %v459_v50  ;;  %v462_v58 = vsel %vm460_vm6, %v459_v50, %v457_v54  ;;  %v1535_v35 = vld [vmem:[%s2363_s1 + $0x50] sm:$0xff] }
  0x8f   :  { %v395_v60 = vmul.f32 %v1834_v47, %v386_v55  ;;  %v396_v61 = vmul.f32 %v1839_v49, %v387_v56  ;;  %v470_v62 = vmul.f32 %v1842_v51, %v461_v57  ;;  %v471_v63 = vmul.f32 %v1844_v52, %v462_v58 }
  0x91   :  { %496 = vmatpush.msra.mxu0 %v470_v62  ;;  %519 = vmatpush.msra.mxu1 %v471_v63 }
  0x92   :  { %1510 = vmatmul.msk.f32.vlgmr.msrb.gmra.mxu2 %vm67_vm1, %v46_v59  ;;  %1512 = vmatmul.msk.f32.vlgmr.msrb.gmra.mxu3 %vm67_vm1, %v46_v59 }
  0x93   :  { %421 = vmatpush.msrb.mxu2 %v395_v60  ;;  %444 = vmatpush.msrb.mxu3 %v396_v61 }
  0x94   :  { %1544 = vmatmul.msk.f32.vlgmr.msra.gmra.mxu0 %vm67_vm1, %v1542_v6  ;;  %1546 = vmatmul.msk.f32.vlgmr.msra.gmra.mxu1 %vm67_vm1, %v1542_v6 }
  0x95   :  { %v532_v1 = vpop.permute.xlu0 %531  ;;  %v534_v5 = vpop.permute.xlu1 %533 }
  0x96   :  { %v536_v15 = vsel %vm535_vm7, %v532_v1, %v534_v5  ;;  %v537_v16 = vsel %vm535_vm7, %v534_v5, %v532_v1 }
  0x97   :  { %v545_v25 = vmul.f32 %v1882_v7, %v536_v15  ;;  %v546_v26 = vmul.f32 %v1887_v11, %v537_v16 }
  0x9a   :  { %1511 = vmatmul.msk.f32.gmra.mxu2 %vm67_vm1, %v47_v2  ;;  %1513 = vmatmul.msk.f32.gmra.mxu3 %vm67_vm1, %v47_v2 }
  0x9c   :  { %1545 = vmatmul.msk.f32.gmra.mxu0 %vm67_vm1, %v1543_v29  ;;  %1547 = vmatmul.msk.f32.gmra.mxu1 %vm67_vm1, %v1543_v29 }
  0x9d   :  { %v609_v17 = vpop.permute.xlu0 %608 }
  0x9e   :  { %v611_v22 = vsel %vm610_vm8, %v607_v12, %v609_v17  ;;  %v612_v23 = vsel %vm610_vm8, %v609_v17, %v607_v12 }
  0x9f   :  { %v620_v27 = vmul.f32 %v1890_v13, %v611_v22  ;;  %v621_v28 = vmul.f32 %v1892_v14, %v612_v23 }
  0xa1   :  { %646 = vmatpush.msrb.mxu0 %v620_v27  ;;  %669 = vmatpush.msrb.mxu1 %v621_v28 }
  0xa2   :  { %1524 = vmatmul.msk.f32.vlgmr.msra.gmra.mxu2 %vm67_vm1, %v1522_v24  ;;  %1526 = vmatmul.msk.f32.vlgmr.msra.gmra.mxu3 %vm67_vm1, %v1522_v24 }
  0xa3   :  { %571 = vmatpush.msra.mxu2 %v545_v25  ;;  %594 = vmatpush.msra.mxu3 %v546_v26 }
  0xa4   :  { %1558 = vmatmul.msk.f32.vlgmr.msrb.gmra.mxu0 %vm67_vm1, %v1556_v31  ;;  %1560 = vmatmul.msk.f32.vlgmr.msrb.gmra.mxu1 %vm67_vm1, %v1556_v31 }
  0xaa   :  { %1525 = vmatmul.msk.f32.gmra.mxu2 %vm67_vm1, %v1523_v30  ;;  %1527 = vmatmul.msk.f32.gmra.mxu3 %vm67_vm1, %v1523_v30 }
  0xac   :  { %1559 = vmatmul.msk.f32.gmra.mxu0 %vm67_vm1, %v1557_v38  ;;  %1561 = vmatmul.msk.f32.gmra.mxu1 %vm67_vm1, %v1557_v38 }
  0xb2   :  { %1537 = vmatmul.msk.f32.vlgmr.msrb.gmra.mxu2 %vm67_vm1, %v1535_v35  ;;  %1539 = vmatmul.msk.f32.vlgmr.msrb.gmra.mxu3 %vm67_vm1, %v1535_v35 }
  0xba   :  { %1538 = vmatmul.msk.f32.gmra.mxu2 %vm67_vm1, %v1536_v39  ;;  %1540 = vmatmul.msk.f32.gmra.mxu3 %vm67_vm1, %v1536_v39 }
  0xc2   :  { %1551 = vmatmul.msk.f32.vlgmr.msra.gmra.mxu2 %vm67_vm1, %v1549_v40  ;;  %1553 = vmatmul.msk.f32.vlgmr.msra.gmra.mxu3 %vm67_vm1, %v1549_v40 }
  0xca   :  { %1552 = vmatmul.msk.f32.gmra.mxu2 %vm67_vm1, %v1550_v41  ;;  %1554 = vmatmul.msk.f32.gmra.mxu3 %vm67_vm1, %v1550_v41 }
  0xe8   :  { %v214_v44 = vpop.f32.mrf.mxu0  ;;  %v237_v45 = vpop.f32.mrf.mxu1 }
  0xf0   :  { %v217_v50 = vpop.f32.mrf.mxu0  ;;  %v240_v53 = vpop.f32.mrf.mxu1 }
  0xf8   :  { %v348_v56 = vpop.f32.mrf.mxu0  ;;  %v371_v57 = vpop.f32.mrf.mxu1 }
 0x101   :  { %v351_v60 = vpop.f32.mrf.mxu0  ;;  %v374_v61 = vpop.f32.mrf.mxu1 }
 0x105   :  { %v91_v42 = vpop.f32.mrf.mxu2  ;;  %v114_v43 = vpop.f32.mrf.mxu3 }
 0x10d   :  { %v94_v46 = vpop.f32.mrf.mxu2  ;;  %v117_v48 = vpop.f32.mrf.mxu3 }
 0x111   :  { %v498_v2 = vpop.f32.mrf.mxu0  ;;  %v521_v3 = vpop.f32.mrf.mxu1 }
 0x115   :  { %v143_v54 = vpop.f32.mrf.mxu2  ;;  %v166_v55 = vpop.f32.mrf.mxu3 }
 0x116   :  { %v144_v5 = vadd.f32 %v143_v54, %v91_v42  ;;  %v167_v6 = vadd.f32 %v166_v55, %v114_v43  ;;  %v686_v55 = vpop.permute.xlu2 %685 }
 0x118   :  { %v243_v15 = vadd.f32 %v214_v44, %v144_v5  ;;  %v244_v16 = vadd.f32 %v237_v45, %v167_v6 }
 0x119   :  { %v501_v17 = vpop.f32.mrf.mxu0  ;;  %v524_v22 = vpop.f32.mrf.mxu1 }
 0x11d   :  { %v146_v58 = vpop.f32.mrf.mxu2  ;;  %v169_v59 = vpop.f32.mrf.mxu3 }
 0x11e   :  { %v147_v25 = vadd.f32 %v146_v58, %v94_v46  ;;  %v170_v26 = vadd.f32 %v169_v59, %v117_v48 }
 0x120   :  { %v245_v31 = vadd.f32 %v217_v50, %v147_v25  ;;  %v246_v32 = vadd.f32 %v240_v53, %v170_v26 }
 0x121   :  { %v648_v39 = vpop.f32.mrf.mxu0  ;;  %v671_v40 = vpop.f32.mrf.mxu1 }
 0x125   :  { %v289_v62 = vpop.f32.mrf.mxu2  ;;  %v312_v63 = vpop.f32.mrf.mxu3 }
 0x126   :  { %v318_v23 = vadd.f32 %v289_v62, %v243_v15  ;;  %v319_v24 = vadd.f32 %v312_v63, %v244_v16 }
 0x128   :  { %v377_v29 = vadd.f32 %v348_v56, %v318_v23  ;;  %v378_v30 = vadd.f32 %v371_v57, %v319_v24  ;;  %v1352_v24 = vld [vmem:[%s2366_s4] sm:$0xff] }
 0x12d   :  { %v292_v0 = vpop.f32.mrf.mxu2  ;;  %v315_v1 = vpop.f32.mrf.mxu3 }
 0x12e   :  { %v320_v35 = vadd.f32 %v292_v0, %v245_v31  ;;  %v321_v38 = vadd.f32 %v315_v1, %v246_v32 }
 0x130   :  { %v379_v45 = vadd.f32 %v351_v60, %v320_v35  ;;  %v380_v54 = vadd.f32 %v374_v61, %v321_v38 }
 0x135   :  { %v423_v9 = vpop.f32.mrf.mxu2  ;;  %v446_v12 = vpop.f32.mrf.mxu3 }
 0x136   :  { %v452_v33 = vadd.f32 %v423_v9, %v377_v29  ;;  %v453_v34 = vadd.f32 %v446_v12, %v378_v30  ;;  %v691_v9 = vpop.permute.xlu1 %690 }
 0x138   :  { %v527_v41 = vadd.f32 %v498_v2, %v452_v33  ;;  %v528_v42 = vadd.f32 %v521_v3, %v453_v34  ;;  %v651_v2 = vpop.f32.mrf.mxu0  ;;  %v674_v3 = vpop.f32.mrf.mxu1 }
 0x13d   :  { %v426_v27 = vpop.f32.mrf.mxu2  ;;  %v449_v28 = vpop.f32.mrf.mxu3 }
 0x13e   :  { %v454_v58 = vadd.f32 %v426_v27, %v379_v45  ;;  %v455_v56 = vadd.f32 %v449_v28, %v380_v54 }
 0x140   :  { %v529_v62 = vadd.f32 %v501_v17, %v454_v58  ;;  %v530_v63 = vadd.f32 %v524_v22, %v455_v56 }
 0x145   :  { %v573_v43 = vpop.f32.mrf.mxu2  ;;  %v596_v44 = vpop.f32.mrf.mxu3 }
 0x146   :  { %v602_v46 = vadd.f32 %v573_v43, %v527_v41  ;;  %v603_v48 = vadd.f32 %v596_v44, %v528_v42  ;;  %v1562_v43 = vld [vmem:[%s2365_s3 + $0x10] sm:$0xff] }
 0x148   :  { %v677_v57 = vadd.f32 %v648_v39, %v602_v46  ;;  %v678_v50 = vadd.f32 %v671_v40, %v603_v48 }
 0x14a   :  { %v693_v53 = vadd.f32 %v686_v55, %v677_v57  ;;  %v694_v59 = vadd.f32 %v686_v55, %v678_v50 }
 0x14c   :  { %v1959_v0 = vmax.f32 %v693_v53, 0.0  ;;  %v1961_v1 = vmax.f32 %v694_v59, 0.0 }
 0x14d   :  { %v576_v5 = vpop.f32.mrf.mxu2  ;;  %v599_v60 = vpop.f32.mrf.mxu3 }
 0x14e   :  { %v604_v61 = vadd.f32 %v576_v5, %v529_v62  ;;  %v605_v6 = vadd.f32 %v599_v60, %v530_v63  ;;  %847 = vrot.lane.b32.xlu1 %v1961_v1, %s1677_s28  ;;  %723 = vrot.lane.b32.xlu0 %v1961_v1, %s1675_s26 }
 0x14f   :  { %719 = vrot.lane.b32.xlu2 %v1959_v0, %s1675_s26 }
 0x150   :  { %v679_v12 = vadd.f32 %v651_v2, %v604_v61  ;;  %v680_v15 = vadd.f32 %v674_v3, %v605_v6 }
 0x152   :  { %v695_v16 = vadd.f32 %v691_v9, %v679_v12  ;;  %v696_v17 = vadd.f32 %v691_v9, %v680_v15  ;;  %v717_v9 = vld [vmem:[%s2365_s3] sm:$0xff]  ;;  %v1573_v15 = vld [vmem:[%s2365_s3 + $0x28] sm:$0xff] }
 0x154   :  { %v1969_v22 = vmax.f32 %v695_v16, 0.0  ;;  %v1971_v23 = vmax.f32 %v696_v17, 0.0 }
 0x156   :  { %725 = vrot.lane.b32.xlu1 %v1971_v23, %s1675_s26  ;;  %721 = vrot.lane.b32.xlu0 %v1969_v22, %s1675_s26 }
 0x157   :  { %705 = vrot.lane.b32.xlu2 %v1961_v1, %s1676_s27 }
 0x15e   :  { %701 = vrot.lane.b32.xlu1 %v1959_v0, %s1676_s27  ;;  %843 = vrot.lane.b32.xlu0 %v1959_v0, %s1677_s28 }
 0x15f   :  { %849 = vrot.lane.b32.xlu2 %v1971_v23, %s1677_s28 }
 0x166   :  { %845 = vrot.lane.b32.xlu1 %v1969_v22, %s1677_s28  ;;  %707 = vrot.lane.b32.xlu0 %v1971_v23, %s1676_s27 }
 0x167   :  { %703 = vrot.lane.b32.xlu2 %v1969_v22, %s1676_s27 }
 0x16e   :  { %1131 = vrot.lane.b32.xlu1 %v1961_v1, %s1680_s10  ;;  %922 = vrot.lane.b32.xlu0 %v1961_v1, %s1678_s8 }
 0x16f   :  { %918 = vrot.lane.b32.xlu2 %v1959_v0, %s1678_s8 }
 0x176   :  { %924 = vrot.lane.b32.xlu1 %v1971_v23, %s1678_s8  ;;  %920 = vrot.lane.b32.xlu0 %v1969_v22, %s1678_s8 }
 0x177   :  { %1056 = vrot.lane.b32.xlu2 %v1961_v1, %s1679_s9 }
 0x17e   :  { %1052 = vrot.lane.b32.xlu1 %v1959_v0, %s1679_s9  ;;  %1127 = vrot.lane.b32.xlu0 %v1959_v0, %s1680_s10 }
 0x17f   :  { %1133 = vrot.lane.b32.xlu2 %v1971_v23, %s1680_s10 }
 0x186   :  { %1129 = vrot.lane.b32.xlu1 %v1969_v22, %s1680_s10  ;;  %1058 = vrot.lane.b32.xlu0 %v1971_v23, %s1679_s9 }
 0x187   :  { %1054 = vrot.lane.b32.xlu2 %v1969_v22, %s1679_s9 }
 0x18e   :  { %1283 = vrot.lane.b32.xlu1 %v1971_v23, %s1682_s11  ;;  %1281 = vrot.lane.b32.xlu0 %v1961_v1, %s1682_s11 }
 0x18f   :  { %1277 = vrot.lane.b32.xlu2 %v1959_v0, %s1682_s11 }
 0x196   :  { %1204 = vrot.lane.b32.xlu1 %v1969_v22, %s1681_s0  ;;  %1279 = vrot.lane.b32.xlu0 %v1969_v22, %s1682_s11 }
 0x197   :  { %1208 = vrot.lane.b32.xlu2 %v1971_v23, %s1681_s0 }
 0x19e   :  { %1206 = vrot.lane.b32.xlu1 %v1961_v1, %s1681_s0  ;;  %1202 = vrot.lane.b32.xlu0 %v1959_v0, %s1681_s0 }
 0x19f   :  { %1356 = vperm.xlu2 %1627, %v1352_v24  }
 0x1a9   :  { %v720_v25 = vpop.permute.xlu2 %719 }
 0x1b1   :  { %v706_v26 = vpop.permute.xlu2 %705 }
 0x1b9   :  { %v850_v29 = vpop.permute.xlu2 %849 }
 0x1c0   :  { %v848_v27 = vpop.permute.xlu1 %847  ;;  %v724_v28 = vpop.permute.xlu0 %723 }
 0x1c1   :  { %v727_v32 = vsel %vm52_vm3, %v720_v25, %v724_v28  ;;  %v729_v33 = vsel %vm52_vm3, %v724_v28, %v720_v25  ;;  %v704_v40 = vpop.permute.xlu2 %703 }
 0x1c2   :  { %v731_v41 = vmul.f32 %v729_v33, %v1778_v18  ;;  %v732_v42 = vmul.f32 %v727_v32, %v1780_v19  ;;  %v1579_v32 = vld [vmem:[%s2365_s3 + $0x38] sm:$0xff]  ;;  %v1585_v33 = vld [vmem:[%s2365_s3 + $0x48] sm:$0xff] }
 0x1c8   :  { %v726_v30 = vpop.permute.xlu1 %725  ;;  %v722_v31 = vpop.permute.xlu0 %721 }
 0x1c9   :  { %v728_v34 = vsel %vm52_vm3, %v722_v31, %v726_v30  ;;  %v730_v35 = vsel %vm52_vm3, %v726_v30, %v722_v31  ;;  %v1584_v30 = vld [vmem:[%s2365_s3 + $0x40] sm:$0xff] }
 0x1ca   :  { %v733_v38 = vmul.f32 %v730_v35, %v1778_v18  ;;  %v734_v39 = vmul.f32 %v728_v34, %v1780_v19  ;;  %v1563_v18 = vld [vmem:[%s2365_s3 + $0x18] sm:$0xff]  ;;  %v919_v19 = vpop.permute.xlu2 %918 }
 0x1cc   :  { %759 = vmatpush.msrb.mxu2 %v733_v38  ;;  %782 = vmatpush.msrb.mxu3 %v734_v39 }
 0x1ce   :  { %760 = vmatpush.msrb.mxu2 %v731_v41  ;;  %783 = vmatpush.msrb.mxu3 %v732_v42 }
 0x1cf   :  { %1564 = vmatmul.msk.f32.vlgmr.msrb.gmra.mxu2 %vm738_vm9, %v1562_v43  ;;  %1566 = vmatmul.msk.f32.vlgmr.msrb.gmra.mxu3 %vm738_vm9, %v1562_v43 }
 0x1d0   :  { %v702_v44 = vpop.permute.xlu1 %701  ;;  %v844_v45 = vpop.permute.xlu0 %843 }
 0x1d1   :  { %v709_v54 = vsel %vm35_vm2, %v702_v44, %v706_v26  ;;  %v711_v46 = vsel %vm35_vm2, %v706_v26, %v702_v44  ;;  %v851_v48 = vsel %vm176_vm0, %v844_v45, %v848_v27  ;;  %v853_v55 = vsel %vm176_vm0, %v848_v27, %v844_v45 }
 0x1d2   :  { %v713_v5 = vmul.f32 %v711_v46, %v1782_v20  ;;  %v714_v60 = vmul.f32 %v709_v54, %v1784_v21  ;;  %v855_v61 = vmul.f32 %v853_v55, %v1757_v8  ;;  %v856_v6 = vmul.f32 %v851_v48, %v1761_v10  ;;  %v1057_v12 = vpop.permute.xlu2 %1056 }
 0x1d7   :  { %1565 = vmatmul.msk.f32.gmra.mxu2 %vm738_vm9, %v1563_v18  ;;  %1567 = vmatmul.msk.f32.gmra.mxu3 %vm738_vm9, %v1563_v18 }
 0x1d8   :  { %v846_v58 = vpop.permute.xlu1 %845  ;;  %v708_v56 = vpop.permute.xlu0 %707 }
 0x1d9   :  { %v852_v57 = vsel %vm176_vm0, %v846_v58, %v850_v29  ;;  %v854_v50 = vsel %vm176_vm0, %v850_v29, %v846_v58  ;;  %v710_v53 = vsel %vm35_vm2, %v704_v40, %v708_v56  ;;  %v712_v59 = vsel %vm35_vm2, %v708_v56, %v704_v40  ;;  %v1578_v29 = vld [vmem:[%s2365_s3 + $0x30] sm:$0xff] }
 0x1da   :  { %v857_v62 = vmul.f32 %v854_v50, %v1757_v8  ;;  %v858_v63 = vmul.f32 %v852_v57, %v1761_v10  ;;  %v715_v2 = vmul.f32 %v712_v59, %v1782_v20  ;;  %v716_v3 = vmul.f32 %v710_v53, %v1784_v21  ;;  %v1572_v20 = vld [vmem:[%s2365_s3 + $0x20] sm:$0xff]  ;;  %v718_v21 = vld [vmem:[%s2365_s3 + $0x8] sm:$0xff]  ;;  %v1590_v50 = vld [vmem:[%s2365_s3 + $0x50] sm:$0xff] }
 0x1db   :  { %v1591_v53 = vld [vmem:[%s2365_s3 + $0x58] sm:$0xff]  ;;  %v1597_v59 = vld [vmem:[%s2365_s3 + $0x68] sm:$0xff] }
 0x1dc   :  { %811 = vmatpush.msra.mxu0 %v715_v2  ;;  %834 = vmatpush.msra.mxu1 %v716_v3 }
 0x1dd   :  { %882 = vmatpush.msra.mxu2 %v857_v62  ;;  %905 = vmatpush.msra.mxu3 %v858_v63 }
 0x1de   :  { %812 = vmatpush.msra.mxu0 %v713_v5  ;;  %835 = vmatpush.msra.mxu1 %v714_v60 }
 0x1df   :  { %883 = vmatpush.msra.mxu2 %v855_v61  ;;  %906 = vmatpush.msra.mxu3 %v856_v6 }
 0x1e0   :  { %1568 = vmatmul.msk.f32.vlgmr.msra.gmra.mxu0 %vm738_vm9, %v717_v9  ;;  %1570 = vmatmul.msk.f32.vlgmr.msra.gmra.mxu1 %vm738_vm9, %v717_v9  ;;  %v1132_v8 = vpop.permute.xlu1 %1131  ;;  %v923_v10 = vpop.permute.xlu0 %922 }
 0x1e1   :  { %1574 = vmatmul.msk.f32.vlgmr.msra.gmra.mxu2 %vm738_vm9, %v1572_v20  ;;  %1576 = vmatmul.msk.f32.vlgmr.msra.gmra.mxu3 %vm738_vm9, %v1572_v20  ;;  %v926_v16 = vsel %vm251_vm4, %v919_v19, %v923_v10 }
 0x1e2   :  { %1016 = vmatpush.msrb.mxu2 %v1969_v22  ;;  %1039 = vmatpush.msrb.mxu3 %v1971_v23  ;;  %v931_v28 = vmul.f32 %v926_v16, %v1812_v37  ;;  %v1608_v16 = vld [vmem:[%s2365_s3 + $0x80] sm:$0xff] }
 0x1e4   :  { %1017 = vmatpush.msrb.mxu2 %v1959_v0  ;;  %1040 = vmatpush.msrb.mxu3 %v1961_v1  ;;  %v1134_v0 = vpop.permute.xlu2 %1133  ;;  %v928_v1 = vsel %vm251_vm4, %v923_v10, %v919_v19 }
 0x1e5   :  { %v930_v27 = vmul.f32 %v928_v1, %v1810_v36 }
 0x1e8   :  { %1569 = vmatmul.msk.f32.gmra.mxu0 %vm738_vm9, %v718_v21  ;;  %1571 = vmatmul.msk.f32.gmra.mxu1 %vm738_vm9, %v718_v21  ;;  %v925_v17 = vpop.permute.xlu1 %924  ;;  %v921_v22 = vpop.permute.xlu0 %920 }
 0x1e9   :  { %1575 = vmatmul.msk.f32.gmra.mxu2 %vm738_vm9, %v1573_v15  ;;  %1577 = vmatmul.msk.f32.gmra.mxu3 %vm738_vm9, %v1573_v15  ;;  %v927_v23 = vsel %vm251_vm4, %v921_v22, %v925_v17  ;;  %v929_v24 = vsel %vm251_vm4, %v925_v17, %v921_v22 }
 0x1ea   :  { %v932_v25 = vmul.f32 %v929_v24, %v1810_v36  ;;  %v933_v26 = vmul.f32 %v927_v23, %v1812_v37  ;;  %v1602_v23 = vld [vmem:[%s2365_s3 + $0x70] sm:$0xff]  ;;  %v1609_v24 = vld [vmem:[%s2365_s3 + $0x88] sm:$0xff] }
 0x1ec   :  { %957 = vmatpush.msrb.mxu0 %v932_v25  ;;  %980 = vmatpush.msrb.mxu1 %v933_v26  ;;  %v1055_v37 = vpop.permute.xlu2 %1054 }
 0x1ee   :  { %958 = vmatpush.msrb.mxu0 %v930_v27  ;;  %981 = vmatpush.msrb.mxu1 %v931_v28 }
 0x1f0   :  { %1580 = vmatmul.msk.f32.vlgmr.msrb.gmra.mxu0 %vm738_vm9, %v1578_v29  ;;  %1582 = vmatmul.msk.f32.vlgmr.msrb.gmra.mxu1 %vm738_vm9, %v1578_v29  ;;  %v1053_v31 = vpop.permute.xlu1 %1052  ;;  %v1128_v36 = vpop.permute.xlu0 %1127 }
 0x1f1   :  { %1586 = vmatmul.msk.f32.vlgmr.msrb.gmra.mxu2 %vm738_vm9, %v1584_v30  ;;  %1588 = vmatmul.msk.f32.vlgmr.msrb.gmra.mxu3 %vm738_vm9, %v1584_v30  ;;  %v1060_v34 = vsel %vm385_vm5, %v1053_v31, %v1057_v12  ;;  %v1062_v35 = vsel %vm385_vm5, %v1057_v12, %v1053_v31  ;;  %v1135_v38 = vsel %vm460_vm6, %v1128_v36, %v1132_v8 }
 0x1f2   :  { %v1137_v39 = vsel %vm460_vm6, %v1132_v8, %v1128_v36  ;;  %v1064_v48 = vmul.f32 %v1060_v34, %v1834_v47  ;;  %v1139_v55 = vmul.f32 %v1135_v38, %v1842_v51  ;;  %v1065_v56 = vmul.f32 %v1062_v35, %v1839_v49 }
 0x1f3   :  { %v1140_v57 = vmul.f32 %v1137_v39, %v1844_v52 }
 0x1f4   :  { %v1278_v58 = vpop.permute.xlu2 %1277 }
 0x1f8   :  { %1581 = vmatmul.msk.f32.gmra.mxu0 %vm738_vm9, %v1579_v32  ;;  %1583 = vmatmul.msk.f32.gmra.mxu1 %vm738_vm9, %v1579_v32  ;;  %v1130_v40 = vpop.permute.xlu1 %1129  ;;  %v1059_v41 = vpop.permute.xlu0 %1058 }
 0x1f9   :  { %1587 = vmatmul.msk.f32.gmra.mxu2 %vm738_vm9, %v1585_v33  ;;  %1589 = vmatmul.msk.f32.gmra.mxu3 %vm738_vm9, %v1585_v33  ;;  %v1136_v42 = vsel %vm460_vm6, %v1130_v40, %v1134_v0  ;;  %v1138_v43 = vsel %vm460_vm6, %v1134_v0, %v1130_v40  ;;  %v1061_v44 = vsel %vm385_vm5, %v1055_v37, %v1059_v41 }
 0x1fa   :  { %v1141_v45 = vmul.f32 %v1136_v42, %v1842_v51  ;;  %v1142_v18 = vmul.f32 %v1138_v43, %v1844_v52  ;;  %v1063_v19 = vsel %vm385_vm5, %v1059_v41, %v1055_v37  ;;  %v1066_v54 = vmul.f32 %v1061_v44, %v1834_v47  ;;  %v1596_v47 = vld [vmem:[%s2365_s3 + $0x60] sm:$0xff] }
 0x1fb   :  { %v1067_v46 = vmul.f32 %v1063_v19, %v1839_v49  ;;  %v1353_v49 = vld [vmem:[%s2366_s4 + $0x8] sm:$0xff] }
 0x1fc   :  { %1091 = vmatpush.msra.mxu0 %v1066_v54  ;;  %1166 = vmatpush.msra.mxu2 %v1141_v45  ;;  %v1209_v62 = vpop.permute.xlu2 %1208 }
 0x1fd   :  { %1114 = vmatpush.msra.mxu1 %v1067_v46  ;;  %1189 = vmatpush.msra.mxu3 %v1142_v18 }
 0x1fe   :  { %1092 = vmatpush.msra.mxu0 %v1064_v48  ;;  %1167 = vmatpush.msra.mxu2 %v1139_v55 }
 0x1ff   :  { %1115 = vmatpush.msra.mxu1 %v1065_v56  ;;  %1190 = vmatpush.msra.mxu3 %v1140_v57 }
 0x200   :  { %1592 = vmatmul.msk.f32.vlgmr.msra.gmra.mxu0 %vm738_vm9, %v1590_v50  ;;  %1594 = vmatmul.msk.f32.vlgmr.msra.gmra.mxu1 %vm738_vm9, %v1590_v50  ;;  %v1284_v51 = vpop.permute.xlu1 %1283  ;;  %v1282_v52 = vpop.permute.xlu0 %1281 }
 0x201   :  { %1598 = vmatmul.msk.f32.vlgmr.msra.gmra.mxu2 %vm738_vm9, %v1596_v47  ;;  %1600 = vmatmul.msk.f32.vlgmr.msra.gmra.mxu3 %vm738_vm9, %v1596_v47  ;;  %v1285_v63 = vsel %vm610_vm8, %v1278_v58, %v1282_v52  ;;  %v1287_v2 = vsel %vm610_vm8, %v1282_v52, %v1278_v58 }
 0x202   :  { %1361 = vperm.xlu0 %1628, %v1353_v49   ;;  %v1289_v21 = vmul.f32 %v1285_v63, %v1890_v13  ;;  %v1290_v15 = vmul.f32 %v1287_v2, %v1892_v14 }
 0x208   :  { %1593 = vmatmul.msk.f32.gmra.mxu0 %vm738_vm9, %v1591_v53  ;;  %1595 = vmatmul.msk.f32.gmra.mxu1 %vm738_vm9, %v1591_v53  ;;  %v1205_v3 = vpop.permute.xlu1 %1204  ;;  %v1280_v5 = vpop.permute.xlu0 %1279 }
 0x209   :  { %1599 = vmatmul.msk.f32.gmra.mxu2 %vm738_vm9, %v1597_v59  ;;  %1601 = vmatmul.msk.f32.gmra.mxu3 %vm738_vm9, %v1597_v59  ;;  %v1211_v60 = vsel %vm535_vm7, %v1205_v3, %v1209_v62  ;;  %v1213_v61 = vsel %vm535_vm7, %v1209_v62, %v1205_v3  ;;  %v1286_v6 = vsel %vm610_vm8, %v1280_v5, %v1284_v51 }
 0x20a   :  { %v1216_v9 = vmul.f32 %v1211_v60, %v1882_v7  ;;  %v1217_v20 = vmul.f32 %v1213_v61, %v1887_v11  ;;  %v1288_v12 = vsel %vm610_vm8, %v1284_v51, %v1280_v5  ;;  %v1291_v8 = vmul.f32 %v1286_v6, %v1890_v13 }
 0x20b   :  { %v1292_v10 = vmul.f32 %v1288_v12, %v1892_v14 }
 0x20c   :  { %1241 = vmatpush.msrb.mxu0 %v1216_v9  ;;  %1264 = vmatpush.msrb.mxu1 %v1217_v20 }
 0x20d   :  { %1316 = vmatpush.msrb.mxu2 %v1291_v8  ;;  %1339 = vmatpush.msrb.mxu3 %v1292_v10 }
 0x20f   :  { %1317 = vmatpush.msrb.mxu2 %v1289_v21  ;;  %1340 = vmatpush.msrb.mxu3 %v1290_v15 }
 0x210   :  { %v1207_v17 = vpop.permute.xlu1 %1206  ;;  %v1203_v22 = vpop.permute.xlu0 %1202 }
 0x211   :  { %v1210_v0 = vsel %vm535_vm7, %v1203_v22, %v1207_v17  ;;  %v1212_v1 = vsel %vm535_vm7, %v1207_v17, %v1203_v22  ;;  %1610 = vmatmul.msk.f32.vlgmr.msrb.gmra.mxu2 %vm738_vm9, %v1608_v16  ;;  %1612 = vmatmul.msk.f32.vlgmr.msrb.gmra.mxu3 %vm738_vm9, %v1608_v16 }
 0x212   :  { %v1214_v13 = vmul.f32 %v1210_v0, %v1882_v7  ;;  %v1215_v14 = vmul.f32 %v1212_v1, %v1887_v11  ;;  %v1603_v7 = vld [vmem:[%s2365_s3 + $0x78] sm:$0xff]  ;;  %v1357_v0 = vpop.permute.xlu2 %1356 }
 0x214   :  { %1242 = vmatpush.msrb.mxu0 %v1214_v13  ;;  %1265 = vmatpush.msrb.mxu1 %v1215_v14 }
 0x215   :  { %1604 = vmatmul.msk.f32.vlgmr.msrb.gmra.mxu0 %vm738_vm9, %v1602_v23  ;;  %1606 = vmatmul.msk.f32.vlgmr.msrb.gmra.mxu1 %vm738_vm9, %v1602_v23 }
 0x219   :  { %1611 = vmatmul.msk.f32.gmra.mxu2 %vm738_vm9, %v1609_v24  ;;  %1613 = vmatmul.msk.f32.gmra.mxu3 %vm738_vm9, %v1609_v24 }
 0x21d   :  { %1605 = vmatmul.msk.f32.gmra.mxu0 %vm738_vm9, %v1603_v7  ;;  %1607 = vmatmul.msk.f32.gmra.mxu1 %vm738_vm9, %v1603_v7 }
 0x252   :  { %v762_v11 = vpop.f32.mrf.mxu2  ;;  %v785_v25 = vpop.f32.mrf.mxu3 }
 0x25a   :  { %v765_v26 = vpop.f32.mrf.mxu2  ;;  %v788_v27 = vpop.f32.mrf.mxu3 }
 0x25d   :  { %v814_v28 = vpop.f32.mrf.mxu0  ;;  %v837_v29 = vpop.f32.mrf.mxu1 }
 0x25e   :  { %v815_v54 = vadd.f32 %v814_v28, %v762_v11  ;;  %v838_v46 = vadd.f32 %v837_v29, %v785_v25 }
 0x264   :  { %v885_v30 = vpop.f32.mrf.mxu2  ;;  %v908_v31 = vpop.f32.mrf.mxu3 }
 0x265   :  { %v817_v36 = vpop.f32.mrf.mxu0  ;;  %v840_v37 = vpop.f32.mrf.mxu1  ;;  %v914_v48 = vadd.f32 %v885_v30, %v815_v54  ;;  %v915_v55 = vadd.f32 %v908_v31, %v838_v46 }
 0x266   :  { %v818_v53 = vadd.f32 %v817_v36, %v765_v26  ;;  %v841_v59 = vadd.f32 %v840_v37, %v788_v27 }
 0x26c   :  { %v888_v32 = vpop.f32.mrf.mxu2  ;;  %v911_v33 = vpop.f32.mrf.mxu3 }
 0x26d   :  { %v960_v34 = vpop.f32.mrf.mxu0  ;;  %v983_v35 = vpop.f32.mrf.mxu1  ;;  %v916_v2 = vadd.f32 %v888_v32, %v818_v53  ;;  %v917_v3 = vadd.f32 %v911_v33, %v841_v59  ;;  %v1434_v53 = vld [vmem:[%s2368_s6 + $0xf0] sm:$0xff]  ;;  %v1417_v59 = vld [vmem:[%s2368_s6 + $0x68] sm:$0xff] }
 0x26e   :  { %v989_v57 = vadd.f32 %v960_v34, %v914_v48  ;;  %v990_v50 = vadd.f32 %v983_v35, %v915_v55 }
 0x274   :  { %v1019_v38 = vpop.f32.mrf.mxu2  ;;  %v1042_v39 = vpop.f32.mrf.mxu3 }
 0x275   :  { %v963_v40 = vpop.f32.mrf.mxu0  ;;  %v986_v41 = vpop.f32.mrf.mxu1  ;;  %v1048_v51 = vadd.f32 %v1019_v38, %v989_v57  ;;  %v1049_v52 = vadd.f32 %v1042_v39, %v990_v50 }
 0x276   :  { %v991_v9 = vadd.f32 %v963_v40, %v916_v2  ;;  %v992_v20 = vadd.f32 %v986_v41, %v917_v3  ;;  %v1362_v31 = vpop.permute.xlu0 %1361  ;;  %v1432_v2 = vld [vmem:[%s2368_s6 + $0xe0] sm:$0xff]  ;;  %v1415_v3 = vld [vmem:[%s2368_s6 + $0x58] sm:$0xff] }
 0x27c   :  { %v1022_v42 = vpop.f32.mrf.mxu2  ;;  %v1045_v43 = vpop.f32.mrf.mxu3 }
 0x27d   :  { %v1094_v44 = vpop.f32.mrf.mxu0  ;;  %v1117_v45 = vpop.f32.mrf.mxu1  ;;  %v1050_v15 = vadd.f32 %v1022_v42, %v991_v9  ;;  %v1051_v16 = vadd.f32 %v1045_v43, %v992_v20  ;;  %v1429_v9 = vld [vmem:[%s2368_s6 + $0xc8] sm:$0xff]  ;;  %v1412_v20 = vld [vmem:[%s2368_s6 + $0x40] sm:$0xff] }
 0x27e   :  { %v1123_v62 = vadd.f32 %v1094_v44, %v1048_v51  ;;  %v1124_v63 = vadd.f32 %v1117_v45, %v1049_v52  ;;  %v1435_v51 = vld [vmem:[%s2368_s6 + $0xf8] sm:$0xff]  ;;  %v1418_v52 = vld [vmem:[%s2368_s6 + $0x70] sm:$0xff] }
 0x27f   :  { %1459 = vmatpush.msra.mxu1 %v1435_v51 }
 0x281   :  { %1460 = vmatpush.msra.mxu1 %v1434_v53 }
 0x284   :  { %v1169_v18 = vpop.f32.mrf.mxu2  ;;  %v1192_v19 = vpop.f32.mrf.mxu3 }
 0x285   :  { %v1097_v58 = vpop.f32.mrf.mxu0  ;;  %v1120_v56 = vpop.f32.mrf.mxu1  ;;  %v1198_v5 = vadd.f32 %v1169_v18, %v1123_v62  ;;  %v1199_v60 = vadd.f32 %v1192_v19, %v1124_v63  ;;  %v1433_v62 = vld [vmem:[%s2368_s6 + $0xe8] sm:$0xff]  ;;  %v1416_v63 = vld [vmem:[%s2368_s6 + $0x60] sm:$0xff] }
 0x286   :  { %v1125_v1 = vadd.f32 %v1097_v58, %v1050_v15  ;;  %v1126_v13 = vadd.f32 %v1120_v56, %v1051_v16  ;;  %1461 = vmatpush.msra.mxu1 %v1433_v62  ;;  %v1426_v15 = vld [vmem:[%s2368_s6 + $0xb0] sm:$0xff]  ;;  %v1409_v16 = vld [vmem:[%s2368_s6 + $0x28] sm:$0xff] }
 0x288   :  { %1462 = vmatpush.msra.mxu1 %v1432_v2 }
 0x28c   :  { %v1172_v47 = vpop.f32.mrf.mxu2  ;;  %v1195_v49 = vpop.f32.mrf.mxu3 }
 0x28d   :  { %v1200_v24 = vadd.f32 %v1172_v47, %v1125_v1  ;;  %v1201_v7 = vadd.f32 %v1195_v49, %v1126_v13  ;;  %v1419_v49 = vld [vmem:[%s2368_s6 + $0x78] sm:$0xff] }
 0x28e   :  { %1436 = vmatpush.msra.mxu0 %v1419_v49  ;;  %v1407_v1 = vld [vmem:[%s2368_s6 + $0x18] sm:$0xff] }
 0x28f   :  { %v1423_v13 = vld [vmem:[%s2368_s6 + $0x98] sm:$0xff] }
 0x290   :  { %1437 = vmatpush.msra.mxu0 %v1418_v52 }
 0x292   :  { %v1244_v61 = vpop.f32.mrf.mxu0  ;;  %v1267_v6 = vpop.f32.mrf.mxu1  ;;  %1438 = vmatpush.msra.mxu0 %v1417_v59 }
 0x293   :  { %v1273_v12 = vadd.f32 %v1244_v61, %v1198_v5  ;;  %v1274_v8 = vadd.f32 %v1267_v6, %v1199_v60  ;;  %v1431_v5 = vld [vmem:[%s2368_s6 + $0xd8] sm:$0xff]  ;;  %v1414_v60 = vld [vmem:[%s2368_s6 + $0x50] sm:$0xff]  ;;  %v1413_v6 = vld [vmem:[%s2368_s6 + $0x48] sm:$0xff] }
 0x294   :  { %v1319_v10 = vpop.f32.mrf.mxu2  ;;  %v1342_v21 = vpop.f32.mrf.mxu3  ;;  %1439 = vmatpush.msra.mxu0 %v1416_v63  ;;  %v1430_v61 = vld [vmem:[%s2368_s6 + $0xd0] sm:$0xff]  ;;  %1463 = vmatpush.msra.mxu1 %v1431_v5 }
 0x295   :  { %v1348_v17 = vadd.f32 %v1319_v10, %v1273_v12  ;;  %v1349_v22 = vadd.f32 %v1342_v21, %v1274_v8  ;;  %v1428_v12 = vld [vmem:[%s2368_s6 + $0xc0] sm:$0xff]  ;;  %v1411_v8 = vld [vmem:[%s2368_s6 + $0x38] sm:$0xff]  ;;  %v1410_v21 = vld [vmem:[%s2368_s6 + $0x30] sm:$0xff] }
 0x296   :  { %1440 = vmatpush.msra.mxu0 %v1415_v3  ;;  %1464 = vmatpush.msra.mxu1 %v1430_v61  ;;  %v1427_v10 = vld [vmem:[%s2368_s6 + $0xb8] sm:$0xff] }
 0x297   :  { %v1364_v14 = vadd.f32 %v1357_v0, %v1348_v17  ;;  %v1365_v23 = vadd.f32 %v1357_v0, %v1349_v22  ;;  %v1425_v17 = vld [vmem:[%s2368_s6 + $0xa8] sm:$0xff]  ;;  %v1408_v22 = vld [vmem:[%s2368_s6 + $0x20] sm:$0xff] }
 0x298   :  { %1441 = vmatpush.msra.mxu0 %v1414_v60  ;;  %1465 = vmatpush.msra.mxu1 %v1429_v9  ;;  %v1424_v0 = vld [vmem:[%s2368_s6 + $0xa0] sm:$0xff] }
 0x299   :  { %v1368_v11 = vmax.f32 %v1364_v14, 0.0  ;;  %v1369_v25 = vmax.f32 %v1365_v23, 0.0  ;;  %v1406_v14 = vld [vmem:[%s2368_s6 + $0x10] sm:$0xff] }
 0x29a   :  { %v1247_v26 = vpop.f32.mrf.mxu0  ;;  %v1270_v27 = vpop.f32.mrf.mxu1  ;;  %1442 = vmatpush.msra.mxu0 %v1413_v6  ;;  %1466 = vmatpush.msra.mxu1 %v1428_v12  ;;  %v1422_v23 = vld [vmem:[%s2368_s6 + $0x90] sm:$0xff] }
 0x29b   :  { %v1275_v28 = vadd.f32 %v1247_v26, %v1200_v24  ;;  %v1276_v29 = vadd.f32 %v1270_v27, %v1201_v7  ;;  %v1629_v30 = vpack.i.bf16 %v1369_v25, %v1368_v11  ;;  %v1405_v24 = vld [vmem:[%s2368_s6 + $0x8] sm:$0xff] }
 0x29c   :  { %v1322_v36 = vpop.f32.mrf.mxu2  ;;  %v1345_v37 = vpop.f32.mrf.mxu3  ;;  %1443 = vmatpush.msra.mxu0 %v1412_v20  ;;  %1467 = vmatpush.msra.mxu1 %v1427_v10  ;;  %v1421_v7 = vld [vmem:[%s2368_s6 + $0x88] sm:$0xff] }
 0x29d   :  { %v1350_v32 = vadd.f32 %v1322_v36, %v1275_v28  ;;  %v1351_v33 = vadd.f32 %v1345_v37, %v1276_v29  ;;  %1630 = vrot.lane.b32.xlu1 %v1629_v30, %s1679_s9 }
 0x29e   :  { %1444 = vmatpush.msra.mxu0 %v1411_v8  ;;  %1468 = vmatpush.msra.mxu1 %v1426_v15 }
 0x29f   :  { %v1366_v34 = vadd.f32 %v1362_v31, %v1350_v32  ;;  %v1367_v35 = vadd.f32 %v1362_v31, %v1351_v33 }
 0x2a0   :  { %1445 = vmatpush.msra.mxu0 %v1410_v21  ;;  %1469 = vmatpush.msra.mxu1 %v1425_v17 }
 0x2a1   :  { %v1370_v38 = vmax.f32 %v1366_v34, 0.0  ;;  %v1371_v39 = vmax.f32 %v1367_v35, 0.0 }
 0x2a2   :  { %1446 = vmatpush.msra.mxu0 %v1409_v16  ;;  %1470 = vmatpush.msra.mxu1 %v1424_v0 }
 0x2a3   :  { %v1634_v40 = vpack.i.bf16 %v1371_v39, %v1370_v38 }
 0x2a4   :  { %1447 = vmatpush.msra.mxu0 %v1408_v22  ;;  %1471 = vmatpush.msra.mxu1 %v1423_v13 }
 0x2a5   :  { %1635 = vrot.lane.b32.xlu2 %v1634_v40, %s1679_s9 }
 0x2a6   :  { %1448 = vmatpush.msra.mxu0 %v1407_v1  ;;  %1472 = vmatpush.msra.mxu1 %v1422_v23 }
 0x2a8   :  { %1449 = vmatpush.msra.mxu0 %v1406_v14  ;;  %1473 = vmatpush.msra.mxu1 %v1421_v7 }
 0x2aa   :  { %1450 = vmatpush.msra.mxu0 %v1405_v24 }
 0x2ff   :  { %v1636_v41 = vpop.permute.xlu2 %1635 }
 0x300   :  { %v1638_v42 = vunpack.i.h.bf16 %v1636_v41  ;;  %v1637_v43 = vunpack.i.l.bf16 %v1636_v41 }
 0x302   :  { %v1381_v44 = vsel %vm385_vm5, %v1637_v43, %v1638_v42  ;;  %v1383_v45 = vsel %vm385_vm5, %v1638_v42, %v1637_v43 }
 0x303   :  { %v2233_v18 = vmax.f32 %v1370_v38, %v1381_v44  ;;  %v2235_v19 = vmax.f32 %v1371_v39, %v1383_v45 }
 0x305   :  { %v1644_v54 = vpack.i.bf16 %v2235_v19, %v2233_v18 }
 0x307   :  { %1645 = vrot.lane.b32.xlu2 %v1644_v54, %s1681_s0 }
 0x30f   :  { %v1631_v46 = vpop.permute.xlu1 %1630 }
 0x310   :  { %v1633_v48 = vunpack.i.h.bf16 %v1631_v46  ;;  %v1632_v55 = vunpack.i.l.bf16 %v1631_v46 }
 0x312   :  { %v1380_v58 = vsel %vm385_vm5, %v1632_v55, %v1633_v48  ;;  %v1382_v56 = vsel %vm385_vm5, %v1633_v48, %v1632_v55 }
 0x313   :  { %v2244_v57 = vmax.f32 %v1368_v11, %v1380_v58  ;;  %v2246_v50 = vmax.f32 %v1369_v25, %v1382_v56  ;;  %v1404_v11 = vld [vmem:[%s2368_s6] sm:$0xff] }
 0x314   :  { %v1420_v25 = vld [vmem:[%s2368_s6 + $0x80] sm:$0xff]  ;;  %1451 = vmatpush.msra.mxu0 %v1404_v11  ;;  %s1684_s6 = smov [#allocation2]  }
 0x315   :  { %v1639_v47 = vpack.i.bf16 %v2246_v50, %v2244_v57  ;;  %1474 = vmatpush.msra.mxu1 %v1420_v25  ;;  %s1489_s12 = sshll.u32 %s1684_s6, 4  ;;  %s1490_s12 = int_to_ptr.vmem [resolvable:$true] %s1489_s12 }
 0x317   :  { %1640 = vrot.lane.b32.xlu1 %v1639_v47, %s1681_s0  ;;  %s1491_s0 = sshll.u32 %s2369_s7, 4  ;;  %s1492_s0 = int_to_ptr.hbm [resolvable:$true] %s1491_s0 }
 0x361   :  { %v1646_v29 = vpop.permute.xlu2 %1645 }
 0x362   :  { %v1648_v32 = vunpack.i.h.bf16 %v1646_v29  ;;  %v1647_v33 = vunpack.i.l.bf16 %v1646_v29 }
 0x364   :  { %v1397_v34 = vsel %vm535_vm7, %v1647_v33, %v1648_v32  ;;  %v1399_v35 = vsel %vm535_vm7, %v1648_v32, %v1647_v33 }
 0x365   :  { %v1402_v38 = vmax.f32 %v2233_v18, %v1397_v34  ;;  %v1403_v39 = vmax.f32 %v2235_v19, %v1399_v35 }
 0x389   :  { %v1641_v26 = vpop.permute.xlu1 %1640 }
 0x38a   :  { %v1643_v27 = vunpack.i.h.bf16 %v1641_v26  ;;  %v1642_v28 = vunpack.i.l.bf16 %v1641_v26 }
 0x38c   :  { %v1396_v30 = vsel %vm535_vm7, %v1642_v28, %v1643_v27  ;;  %v1398_v31 = vsel %vm535_vm7, %v1643_v27, %v1642_v28 }
 0x38d   :  { %v1400_v36 = vmax.f32 %v2244_v57, %v1396_v30  ;;  %v1401_v37 = vmax.f32 %v2246_v50, %v1398_v31 }
 0x38f   :  { %1452 = vmatmul.f32.vlgmr.msra.gmra.mxu0 %v1400_v36  ;;  %1475 = vmatmul.f32.vlgmr.msra.gmra.mxu1 %v1401_v37 }
 0x397   :  { %1455 = vmatmul.f32.gmra.mxu0 %v1402_v38  ;;  %1478 = vmatmul.f32.gmra.mxu1 %v1403_v39 }
 0x40c   :  { %v1453_v40 = vpop.f32.mrf.mxu0  ;;  %v1476_v41 = vpop.f32.mrf.mxu1 }
 0x40d   :  { %v1477_v42 = vadd.f32 %v1476_v41, %v1453_v40 }
 0x40f   :  { %1483 = vst.msk [vmem:[#allocation2] sm:$0xff] %vm1482_vm10, %v1477_v42 }
 0x414   :  { %v1456_v43 = vpop.f32.mrf.mxu0  ;;  %v1479_v4 = vpop.f32.mrf.mxu1 }
 0x415   :  { %v1480_v44 = vadd.f32 %v1479_v4, %v1456_v43 }
 0x417   :  { %1484 = vst.msk [vmem:[#allocation2 + $0x8] sm:$0xff] %vm1482_vm10, %v1480_v44 }
 0x418   :  { %1497 = dma.vmem_to_hbm [thread:$0]  %s1490_s12, 256, %s1492_s0, [#allocation3], %s1685_s5, %s1685_s5, %s1686_s14  }
 0x419   :  { %1673 = dma.done.wait [#allocation3], 256  }
 0x41a   :  { %1674 = vsyncadd [#allocation3], 4294967040 }
 0x41b   :  { %1502 = vsyncpa [#allocation3], 1 }

</bundles_post_ra>
